<compile_context>
chip_gen: v7x
topology: tpu7x:2x2x1
jax: 0.10.0
libtpu: 0.0.40
codegen_flags: <defaults>
</compile_context>

<pallas_src>
import functools
import math

import jax
import jax.numpy as jnp
from jax import lax
from jax.experimental import pallas as pl
from jax.experimental.pallas import tpu as pltpu

LN_EPS = 1e-12  # BERT LayerNorm epsilon


# ----------------------------- in-kernel helpers -----------------------------

def _layernorm(x, gamma, beta):
    mu = jnp.mean(x, axis=-1, keepdims=True)
    var = jnp.mean(jnp.square(x - mu), axis=-1, keepdims=True)
    return (x - mu) * lax.rsqrt(var + LN_EPS) * gamma + beta


def _gelu(x):
    # TODO(synk): HF BERT defaults to erf GELU; tanh approx keeps lowering simple.
    c = math.sqrt(2.0 / math.pi)
    return 0.5 * x * (1.0 + jnp.tanh(c * (x + 0.044715 * x * x * x)))


# --------------------------------- kernel ------------------------------------

def bert_layers_kernel(x0_ref, mask_ref,
                       wq_ref, bq_ref, wk_ref, bk_ref, wv_ref, bv_ref,
                       wo_ref, bo_ref, g1_ref, b1_ref,
                       wi_ref, bi_ref, wo2_ref, bo2_ref, g2_ref, b2_ref,
                       o_ref,
                       acc_ref, q_ref, k_ref, v_ref, ctx_ref,
                       *, num_heads):
    layer = pl.program_id(1)
    TB, S, H = acc_ref.shape
    nh = num_heads
    hd = H // nh

    # First layer of each batch block: seed the VMEM-resident activation from
    # the wrapper-computed (embedding sum + LayerNorm) input.
    @pl.when(layer == 0)
    def _():
        acc_ref[...] = x0_ref[...]

    def x2():
        # Reload from VMEM at each use instead of holding a full-activation
        # value live across the attention section (bounds vreg live ranges).
        return acc_ref[...].reshape(TB * S, H)

    def proj(x, w_ref, b_ref):
        # bf16 operands feed the MXU, f32 accumulation, f32 bias add.
        return jnp.dot(x.astype(w_ref.dtype), w_ref[...],
                       preferred_element_type=jnp.float32) + b_ref[...]

    # QKV projections -> bf16 VMEM scratches (explicit, bounded working set).
    q_ref[...] = proj(x2(), wq_ref, bq_ref).reshape(TB, S, H).astype(q_ref.dtype)
    k_ref[...] = proj(x2(), wk_ref, bk_ref).reshape(TB, S, H).astype(k_ref.dtype)
    v_ref[...] = proj(x2(), wv_ref, bv_ref).reshape(TB, S, H).astype(v_ref.dtype)

    mask = mask_ref[...]  # (TB, 1, S) additive bias, precomputed wrapper-side

    # Per-head attention on lane slices of the Q/K/V scratches: no head
    # transposes, and the live set is a single (TB, S, S) f32 score tile.
    # (1/sqrt(hd) is already folded into wq/bq, so the score tensor is only
    # touched once by the mask add.)
    for h in range(nh):
        sl = slice(h * hd, (h + 1) * hd)
        qh = q_ref[:, :, sl]
        kh = k_ref[:, :, sl]
        vh = v_ref[:, :, sl]
        s = jnp.einsum('bqd,bkd->bqk', qh, kh,
                       preferred_element_type=jnp.float32) + mask
        m = jnp.max(s, axis=-1, keepdims=True)
        p = jnp.exp(s - m)
        p = p * pl.reciprocal(jnp.sum(p, axis=-1, keepdims=True), approx=True)
        ctx_ref[:, :, sl] = jnp.einsum(
            'bqk,bkd->bqd', p.astype(vh.dtype), vh,
            preferred_element_type=jnp.float32).astype(ctx_ref.dtype)

    attn = proj(ctx_ref[...].reshape(TB * S, H), wo_ref, bo_ref)
    h1 = _layernorm(x2() + attn, g1_ref[...], b1_ref[...])

    ff = _gelu(proj(h1, wi_ref, bi_ref))
    out = _layernorm(h1 + proj(ff, wo2_ref, bo2_ref), g2_ref[...], b2_ref[...])
    acc_ref[...] = out.reshape(TB, S, H)

    # Only the last layer writes the output, and only the CLS rows.
    @pl.when(layer == pl.num_programs(1) - 1)
    def _():
        o_ref[...] = out.reshape(TB, S, H)[:, 0:1, :]


# ------------------------------ pallas wrapper --------------------------------

def bert_text_net_forward(tokens, segments, input_masks, params, *, batch_block=1):
    """Mirrors BertTextNet.forward: BERT encoder, then CLS hidden state."""
    B, S = tokens.shape
    H = params['word_emb'].shape[-1]
    L = params['wq'].shape[0]
    nh = params['num_heads']
    hd = H // nh
    tb = batch_block
    assert B % tb == 0 and H % nh == 0
    nb = B // tb

    # glue (no Pallas gather): embedding-table lookups + embedding LayerNorm in
    # plain JAX; keeps word/type/pos tables + emb-LN params out of kernel VMEM.
    x0 = (params['word_emb'][tokens] + params['type_emb'][segments]
          + params['pos_emb'][:S][None, :, :]).astype(jnp.float32)
    mu = jnp.mean(x0, axis=-1, keepdims=True)
    var = jnp.mean(jnp.square(x0 - mu), axis=-1, keepdims=True)
    x0 = ((x0 - mu) * lax.rsqrt(var + LN_EPS)
          * params['emb_ln_g'] + params['emb_ln_b'])

    # HuggingFace extended attention mask, already in its final (B, 1, S) shape.
    mask_bias = ((1.0 - input_masks.astype(jnp.float32)) * -10000.0)[:, None, :]

    # Fold the 1/sqrt(head_dim) attention scale into the query projection once.
    scale = 1.0 / math.sqrt(hd)
    wq = (params['wq'].astype(jnp.float32) * scale).astype(params['wq'].dtype)
    bq = params['bq'] * scale

    def batch_spec(shape):
        tail = (0,) * (len(shape) - 1)
        return pl.BlockSpec((tb,) + tuple(shape[1:]), lambda b, l: (b,) + tail)

    def layer_spec(shape):
        # Leading layer dim squeezed; indexed by the layer grid axis so weight
        # DMA for the next layer is pipelined behind the current layer.
        tail = (0,) * (len(shape) - 1)
        return pl.BlockSpec((None,) + tuple(shape[1:]), lambda b, l: (l,) + tail)

    args = (x0, mask_bias,
            wq, bq, params['wk'], params['bk'], params['wv'], params['bv'],
            params['wo'], params['bo'], params['ln1_g'], params['ln1_b'],
            params['wi'], params['bi'], params['wo2'], params['bo2'],
            params['ln2_g'], params['ln2_b'])
    in_specs = ([batch_spec(a.shape) for a in args[:2]] +
                [layer_spec(a.shape) for a in args[2:]])

    cls = pl.pallas_call(
        functools.partial(bert_layers_kernel, num_heads=nh),
        out_shape=jax.ShapeDtypeStruct((B, 1, H), jnp.float32),
        grid=(nb, L),
        in_specs=in_specs,
        out_specs=pl.BlockSpec((tb, 1, H), lambda b, l: (b, 0, 0)),
        scratch_shapes=[
            pltpu.VMEM((tb, S, H), jnp.float32),   # activation / residual stream
            pltpu.VMEM((tb, S, H), jnp.bfloat16),  # Q
            pltpu.VMEM((tb, S, H), jnp.bfloat16),  # K
            pltpu.VMEM((tb, S, H), jnp.bfloat16),  # V
            pltpu.VMEM((tb, S, H), jnp.bfloat16),  # attention context
        ],
        compiler_params=pltpu.CompilerParams(
            dimension_semantics=("parallel", "arbitrary"),
            vmem_limit_bytes=32 * 1024 * 1024),
    )(*args)

    # output[0][:, 0, :]  -> CLS token embedding
    return cls[:, 0, :]


# ---------------------------- parameter synthesis ------------------------------

def init_params(key, *, vocab=100, type_vocab=2, max_pos=16,
                hidden=32, intermediate=64, num_layers=2, num_heads=4):
    def nrm(k, shape, dtype=jnp.float32):
        return (0.02 * jax.random.normal(k, shape, jnp.float32)).astype(dtype)

    L, H, I = num_layers, hidden, intermediate
    ks = jax.random.split(key, 9)
    bf16 = jnp.bfloat16
    return {
        'num_heads': num_heads,
        'word_emb': nrm(ks[0], (vocab, H)),
        'type_emb': nrm(ks[1], (type_vocab, H)),
        'pos_emb':  nrm(ks[2], (max_pos, H)),
        'emb_ln_g': jnp.ones((H,), jnp.float32),
        'emb_ln_b': jnp.zeros((H,), jnp.float32),
        # Stacked per-layer weights (layer axis first). Matmul weights in bf16
        # (halved DMA bytes, MXU-native); biases / LN params stay f32.
        'wq': nrm(ks[3], (L, H, H), bf16), 'bq': jnp.zeros((L, 1, H), jnp.float32),
        'wk': nrm(ks[4], (L, H, H), bf16), 'bk': jnp.zeros((L, 1, H), jnp.float32),
        'wv': nrm(ks[5], (L, H, H), bf16), 'bv': jnp.zeros((L, 1, H), jnp.float32),
        'wo': nrm(ks[6], (L, H, H), bf16), 'bo': jnp.zeros((L, 1, H), jnp.float32),
        'ln1_g': jnp.ones((L, 1, H), jnp.float32),
        'ln1_b': jnp.zeros((L, 1, H), jnp.float32),
        'wi':  nrm(ks[7], (L, H, I), bf16), 'bi':  jnp.zeros((L, 1, I), jnp.float32),
        'wo2': nrm(ks[8], (L, I, H), bf16), 'bo2': jnp.zeros((L, 1, H), jnp.float32),
        'ln2_g': jnp.ones((L, 1, H), jnp.float32),
        'ln2_b': jnp.zeros((L, 1, H), jnp.float32),
    }


if __name__ == "__main__":
    key = jax.random.PRNGKey(0)
    pkey, tkey = jax.random.split(key)

    B, S, VOCAB, HID = 2, 8, 100, 32
    params = init_params(pkey, vocab=VOCAB, type_vocab=2, max_pos=16,
                         hidden=HID, intermediate=64, num_layers=2, num_heads=4)

    tokens = jax.random.randint(tkey, (B, S), 0, VOCAB, dtype=jnp.int32)
    segments = jnp.zeros((B, S), jnp.int32)
    input_masks = jnp.ones((B, S), jnp.int32)

    out = bert_text_net_forward(tokens, segments, input_masks, params,
                                batch_block=1)
    out = jax.block_until_ready(out)
    assert out.shape == (B, HID) and out.dtype == jnp.float32
    assert bool(jnp.all(jnp.isfinite(out)))
    print("KERNEL_OK")
</pallas_src>

<mosaic_0001>
module attributes {stable_mosaic.version = 11 : i64} {
  func.func @bert_layers_kernel(%arg0: i32, %arg1: i32, %arg2: memref<1x8x32xf32, #tpu.memory_space<vmem>>, %arg3: memref<1x1x8xf32, #tpu.memory_space<vmem>>, %arg4: memref<1x32x32xbf16, #tpu.memory_space<vmem>>, %arg5: memref<1x1x32xf32, #tpu.memory_space<vmem>>, %arg6: memref<1x32x32xbf16, #tpu.memory_space<vmem>>, %arg7: memref<1x1x32xf32, #tpu.memory_space<vmem>>, %arg8: memref<1x32x32xbf16, #tpu.memory_space<vmem>>, %arg9: memref<1x1x32xf32, #tpu.memory_space<vmem>>, %arg10: memref<1x32x32xbf16, #tpu.memory_space<vmem>>, %arg11: memref<1x1x32xf32, #tpu.memory_space<vmem>>, %arg12: memref<1x1x32xf32, #tpu.memory_space<vmem>>, %arg13: memref<1x1x32xf32, #tpu.memory_space<vmem>>, %arg14: memref<1x32x64xbf16, #tpu.memory_space<vmem>>, %arg15: memref<1x1x64xf32, #tpu.memory_space<vmem>>, %arg16: memref<1x64x32xbf16, #tpu.memory_space<vmem>>, %arg17: memref<1x1x32xf32, #tpu.memory_space<vmem>>, %arg18: memref<1x1x32xf32, #tpu.memory_space<vmem>>, %arg19: memref<1x1x32xf32, #tpu.memory_space<vmem>>, %arg20: memref<1x1x32xf32, #tpu.memory_space<vmem>>, %arg21: memref<1x8x32xf32, #tpu.memory_space<vmem>>, %arg22: memref<1x8x32xbf16, #tpu.memory_space<vmem>>, %arg23: memref<1x8x32xbf16, #tpu.memory_space<vmem>>, %arg24: memref<1x8x32xbf16, #tpu.memory_space<vmem>>, %arg25: memref<1x8x32xbf16, #tpu.memory_space<vmem>>) attributes {dimension_semantics = [#tpu.dimension_semantics<parallel>, #tpu.dimension_semantics<arbitrary>], iteration_bounds = array<i64: 2, 2>, scalar_prefetch = 0 : i64, scratch_operands = 5 : i64, tpu.core_type = #tpu.core_type<tc>, window_params = [{transform_indices = @transform_0, window_bounds = array<i64: 1, 8, 32>}, {transform_indices = @transform_1, window_bounds = array<i64: 1, 1, 8>}, {transform_indices = @transform_2, window_bounds = array<i64: 1, 32, 32>}, {transform_indices = @transform_3, window_bounds = array<i64: 1, 1, 32>}, {transform_indices = @transform_4, window_bounds = array<i64: 1, 32, 32>}, {transform_indices = @transform_5, window_bounds = array<i64: 1, 1, 32>}, {transform_indices = @transform_6, window_bounds = array<i64: 1, 32, 32>}, {transform_indices = @transform_7, window_bounds = array<i64: 1, 1, 32>}, {transform_indices = @transform_8, window_bounds = array<i64: 1, 32, 32>}, {transform_indices = @transform_9, window_bounds = array<i64: 1, 1, 32>}, {transform_indices = @transform_10, window_bounds = array<i64: 1, 1, 32>}, {transform_indices = @transform_11, window_bounds = array<i64: 1, 1, 32>}, {transform_indices = @transform_12, window_bounds = array<i64: 1, 32, 64>}, {transform_indices = @transform_13, window_bounds = array<i64: 1, 1, 64>}, {transform_indices = @transform_14, window_bounds = array<i64: 1, 64, 32>}, {transform_indices = @transform_15, window_bounds = array<i64: 1, 1, 32>}, {transform_indices = @transform_16, window_bounds = array<i64: 1, 1, 32>}, {transform_indices = @transform_17, window_bounds = array<i64: 1, 1, 32>}, {transform_indices = @transform_18, window_bounds = array<i64: 1, 1, 32>}]} {
    %c0_i32 = arith.constant 0 : i32
    %0 = arith.cmpi eq, %arg1, %c0_i32 : i32
    %1 = arith.extui %0 : i1 to i32
    %c0_i32_0 = arith.constant 0 : i32
    %2 = arith.cmpi ne, %1, %c0_i32_0 : i32
    scf.if %2 {
      %c0_159 = arith.constant 0 : index
      %c0_160 = arith.constant 0 : index
      %c0_161 = arith.constant 0 : index
      %222 = vector.load %arg2[%c0_159, %c0_160, %c0_161] : memref<1x8x32xf32, #tpu.memory_space<vmem>>, vector<1x8x32xf32>
      %c0_162 = arith.constant 0 : index
      %c0_163 = arith.constant 0 : index
      %c0_164 = arith.constant 0 : index
      %223 = vector.load %arg21[%c0_162, %c0_163, %c0_164] : memref<1x8x32xf32, #tpu.memory_space<vmem>>, vector<1x8x32xf32>
      tpu.vector_store %arg21[%c0_162, %c0_163, %c0_164], %222 {strides = array<i32>} : memref<1x8x32xf32, #tpu.memory_space<vmem>>, vector<1x8x32xf32>,
    } else {
    }
    %c0 = arith.constant 0 : index
    %c0_1 = arith.constant 0 : index
    %c0_2 = arith.constant 0 : index
    %3 = vector.load %arg21[%c0, %c0_1, %c0_2] : memref<1x8x32xf32, #tpu.memory_space<vmem>>, vector<1x8x32xf32>
    %4 = vector.shape_cast %3 : vector<1x8x32xf32> to vector<8x32xf32>
    %5 = arith.truncf %4 : vector<8x32xf32> to vector<8x32xbf16>
    %c0_3 = arith.constant 0 : index
    %c0_4 = arith.constant 0 : index
    %c0_5 = arith.constant 0 : index
    %6 = vector.load %arg4[%c0_3, %c0_4, %c0_5] : memref<1x32x32xbf16, #tpu.memory_space<vmem>>, vector<1x32x32xbf16>
    %7 = vector.shape_cast %6 : vector<1x32x32xbf16> to vector<32x32xbf16>
    %cst = arith.constant dense<0.000000e+00> : vector<8x32xf32>
    %8 = tpu.matmul %5, %7, %cst {dimension_numbers = #tpu.dot_dimension_numbers<[1], [0], [0], [1], [0, 0, 1, 1], [], []>} : vector<8x32xbf16>, vector<32x32xbf16>, vector<8x32xf32> -> vector<8x32xf32>
    %c0_6 = arith.constant 0 : index
    %c0_7 = arith.constant 0 : index
    %c0_8 = arith.constant 0 : index
    %9 = vector.load %arg5[%c0_6, %c0_7, %c0_8] : memref<1x1x32xf32, #tpu.memory_space<vmem>>, vector<1x1x32xf32>
    %10 = vector.shape_cast %9 : vector<1x1x32xf32> to vector<1x32xf32>
    %11 = vector.broadcast %10 : vector<1x32xf32> to vector<8x32xf32>
    %12 = arith.addf %8, %11 : vector<8x32xf32>
    %13 = vector.shape_cast %12 : vector<8x32xf32> to vector<1x8x32xf32>
    %14 = arith.truncf %13 : vector<1x8x32xf32> to vector<1x8x32xbf16>
    %c0_9 = arith.constant 0 : index
    %c0_10 = arith.constant 0 : index
    %c0_11 = arith.constant 0 : index
    %15 = vector.load %arg22[%c0_9, %c0_10, %c0_11] : memref<1x8x32xbf16, #tpu.memory_space<vmem>>, vector<1x8x32xbf16>
    tpu.vector_store %arg22[%c0_9, %c0_10, %c0_11], %14 {strides = array<i32>} : memref<1x8x32xbf16, #tpu.memory_space<vmem>>, vector<1x8x32xbf16>,
    %c0_12 = arith.constant 0 : index
    %c0_13 = arith.constant 0 : index
    %c0_14 = arith.constant 0 : index
    %16 = vector.load %arg21[%c0_12, %c0_13, %c0_14] : memref<1x8x32xf32, #tpu.memory_space<vmem>>, vector<1x8x32xf32>
    %17 = vector.shape_cast %16 : vector<1x8x32xf32> to vector<8x32xf32>
    %18 = arith.truncf %17 : vector<8x32xf32> to vector<8x32xbf16>
    %c0_15 = arith.constant 0 : index
    %c0_16 = arith.constant 0 : index
    %c0_17 = arith.constant 0 : index
    %19 = vector.load %arg6[%c0_15, %c0_16, %c0_17] : memref<1x32x32xbf16, #tpu.memory_space<vmem>>, vector<1x32x32xbf16>
    %20 = vector.shape_cast %19 : vector<1x32x32xbf16> to vector<32x32xbf16>
    %cst_18 = arith.constant dense<0.000000e+00> : vector<8x32xf32>
    %21 = tpu.matmul %18, %20, %cst_18 {dimension_numbers = #tpu.dot_dimension_numbers<[1], [0], [0], [1], [0, 0, 1, 1], [], []>} : vector<8x32xbf16>, vector<32x32xbf16>, vector<8x32xf32> -> vector<8x32xf32>
    %c0_19 = arith.constant 0 : index
    %c0_20 = arith.constant 0 : index
    %c0_21 = arith.constant 0 : index
    %22 = vector.load %arg7[%c0_19, %c0_20, %c0_21] : memref<1x1x32xf32, #tpu.memory_space<vmem>>, vector<1x1x32xf32>
    %23 = vector.shape_cast %22 : vector<1x1x32xf32> to vector<1x32xf32>
    %24 = vector.broadcast %23 : vector<1x32xf32> to vector<8x32xf32>
    %25 = arith.addf %21, %24 : vector<8x32xf32>
    %26 = vector.shape_cast %25 : vector<8x32xf32> to vector<1x8x32xf32>
    %27 = arith.truncf %26 : vector<1x8x32xf32> to vector<1x8x32xbf16>
    %c0_22 = arith.constant 0 : index
    %c0_23 = arith.constant 0 : index
    %c0_24 = arith.constant 0 : index
    %28 = vector.load %arg23[%c0_22, %c0_23, %c0_24] : memref<1x8x32xbf16, #tpu.memory_space<vmem>>, vector<1x8x32xbf16>
    tpu.vector_store %arg23[%c0_22, %c0_23, %c0_24], %27 {strides = array<i32>} : memref<1x8x32xbf16, #tpu.memory_space<vmem>>, vector<1x8x32xbf16>,
    %c0_25 = arith.constant 0 : index
    %c0_26 = arith.constant 0 : index
    %c0_27 = arith.constant 0 : index
    %29 = vector.load %arg21[%c0_25, %c0_26, %c0_27] : memref<1x8x32xf32, #tpu.memory_space<vmem>>, vector<1x8x32xf32>
    %30 = vector.shape_cast %29 : vector<1x8x32xf32> to vector<8x32xf32>
    %31 = arith.truncf %30 : vector<8x32xf32> to vector<8x32xbf16>
    %c0_28 = arith.constant 0 : index
    %c0_29 = arith.constant 0 : index
    %c0_30 = arith.constant 0 : index
    %32 = vector.load %arg8[%c0_28, %c0_29, %c0_30] : memref<1x32x32xbf16, #tpu.memory_space<vmem>>, vector<1x32x32xbf16>
    %33 = vector.shape_cast %32 : vector<1x32x32xbf16> to vector<32x32xbf16>
    %cst_31 = arith.constant dense<0.000000e+00> : vector<8x32xf32>
    %34 = tpu.matmul %31, %33, %cst_31 {dimension_numbers = #tpu.dot_dimension_numbers<[1], [0], [0], [1], [0, 0, 1, 1], [], []>} : vector<8x32xbf16>, vector<32x32xbf16>, vector<8x32xf32> -> vector<8x32xf32>
    %c0_32 = arith.constant 0 : index
    %c0_33 = arith.constant 0 : index
    %c0_34 = arith.constant 0 : index
    %35 = vector.load %arg9[%c0_32, %c0_33, %c0_34] : memref<1x1x32xf32, #tpu.memory_space<vmem>>, vector<1x1x32xf32>
    %36 = vector.shape_cast %35 : vector<1x1x32xf32> to vector<1x32xf32>
    %37 = vector.broadcast %36 : vector<1x32xf32> to vector<8x32xf32>
    %38 = arith.addf %34, %37 : vector<8x32xf32>
    %39 = vector.shape_cast %38 : vector<8x32xf32> to vector<1x8x32xf32>
    %40 = arith.truncf %39 : vector<1x8x32xf32> to vector<1x8x32xbf16>
    %c0_35 = arith.constant 0 : index
    %c0_36 = arith.constant 0 : index
    %c0_37 = arith.constant 0 : index
    %41 = vector.load %arg24[%c0_35, %c0_36, %c0_37] : memref<1x8x32xbf16, #tpu.memory_space<vmem>>, vector<1x8x32xbf16>
    tpu.vector_store %arg24[%c0_35, %c0_36, %c0_37], %40 {strides = array<i32>} : memref<1x8x32xbf16, #tpu.memory_space<vmem>>, vector<1x8x32xbf16>,
    %c0_38 = arith.constant 0 : index
    %c0_39 = arith.constant 0 : index
    %c0_40 = arith.constant 0 : index
    %42 = vector.load %arg3[%c0_38, %c0_39, %c0_40] : memref<1x1x8xf32, #tpu.memory_space<vmem>>, vector<1x1x8xf32>
    %c0_41 = arith.constant 0 : index
    %c0_42 = arith.constant 0 : index
    %c0_43 = arith.constant 0 : index
    %43 = vector.load %arg22[%c0_41, %c0_42, %c0_43] : memref<1x8x32xbf16, #tpu.memory_space<vmem>>, vector<1x8x8xbf16>
    %c0_44 = arith.constant 0 : index
    %c0_45 = arith.constant 0 : index
    %c0_46 = arith.constant 0 : index
    %44 = vector.load %arg23[%c0_44, %c0_45, %c0_46] : memref<1x8x32xbf16, #tpu.memory_space<vmem>>, vector<1x8x8xbf16>
    %c0_47 = arith.constant 0 : index
    %c0_48 = arith.constant 0 : index
    %c0_49 = arith.constant 0 : index
    %45 = vector.load %arg24[%c0_47, %c0_48, %c0_49] : memref<1x8x32xbf16, #tpu.memory_space<vmem>>, vector<1x8x8xbf16>
    "tpu.trace_start"() <{level = 10 : i32, message = "bqd,bkd->bqk"}> : () -> ()
    %cst_50 = arith.constant dense<0.000000e+00> : vector<1x8x8xf32>
    %46 = tpu.matmul %43, %44, %cst_50 {dimension_numbers = #tpu.dot_dimension_numbers<[2], [2], [1], [1], [0, 0, 0, 1, 1, 1], [0], [0]>} : vector<1x8x8xbf16>, vector<1x8x8xbf16>, vector<1x8x8xf32> -> vector<1x8x8xf32>
    "tpu.trace_stop"() : () -> ()
    %47 = vector.broadcast %42 : vector<1x1x8xf32> to vector<1x8x8xf32>
    %48 = arith.addf %46, %47 : vector<1x8x8xf32>
    %cst_51 = arith.constant dense<0xFF800000> : vector<1x8xf32>
    %49 = vector.multi_reduction <maximumf>, %48, %cst_51 [2] : vector<1x8x8xf32> to vector<1x8xf32>
    %50 = vector.shape_cast %49 : vector<1x8xf32> to vector<1x8x1xf32>
    %51 = vector.broadcast %50 : vector<1x8x1xf32> to vector<1x8x8xf32>
    %52 = arith.subf %48, %51 : vector<1x8x8xf32>
    %53 = math.exp %52 : vector<1x8x8xf32>
    %cst_52 = arith.constant dense<0.000000e+00> : vector<1x8xf32>
    %54 = vector.multi_reduction <add>, %53, %cst_52 [2] : vector<1x8x8xf32> to vector<1x8xf32>
    %55 = vector.shape_cast %54 : vector<1x8xf32> to vector<1x8x1xf32>
    %56 = tpu.reciprocal %55 {approx = true} : vector<1x8x1xf32> -> vector<1x8x1xf32>
    %57 = vector.broadcast %56 : vector<1x8x1xf32> to vector<1x8x8xf32>
    %58 = arith.mulf %53, %57 : vector<1x8x8xf32>
    %59 = arith.truncf %58 : vector<1x8x8xf32> to vector<1x8x8xbf16>
    "tpu.trace_start"() <{level = 10 : i32, message = "bqk,bkd->bqd"}> : () -> ()
    %cst_53 = arith.constant dense<0.000000e+00> : vector<1x8x8xf32>
    %60 = tpu.matmul %59, %45, %cst_53 {dimension_numbers = #tpu.dot_dimension_numbers<[2], [1], [1], [2], [0, 0, 0, 1, 1, 2], [0], [0]>} : vector<1x8x8xbf16>, vector<1x8x8xbf16>, vector<1x8x8xf32> -> vector<1x8x8xf32>
    "tpu.trace_stop"() : () -> ()
    %61 = arith.truncf %60 : vector<1x8x8xf32> to vector<1x8x8xbf16>
    %c0_54 = arith.constant 0 : index
    %c0_55 = arith.constant 0 : index
    %c0_56 = arith.constant 0 : index
    %62 = vector.load %arg25[%c0_54, %c0_55, %c0_56] : memref<1x8x32xbf16, #tpu.memory_space<vmem>>, vector<1x8x8xbf16>
    tpu.vector_store %arg25[%c0_54, %c0_55, %c0_56], %61 {strides = array<i32>} : memref<1x8x32xbf16, #tpu.memory_space<vmem>>, vector<1x8x8xbf16>,
    %c0_57 = arith.constant 0 : index
    %c0_58 = arith.constant 0 : index
    %c8 = arith.constant 8 : index
    %63 = vector.load %arg22[%c0_57, %c0_58, %c8] : memref<1x8x32xbf16, #tpu.memory_space<vmem>>, vector<1x8x8xbf16>
    %c0_59 = arith.constant 0 : index
    %c0_60 = arith.constant 0 : index
    %c8_61 = arith.constant 8 : index
    %64 = vector.load %arg23[%c0_59, %c0_60, %c8_61] : memref<1x8x32xbf16, #tpu.memory_space<vmem>>, vector<1x8x8xbf16>
    %c0_62 = arith.constant 0 : index
    %c0_63 = arith.constant 0 : index
    %c8_64 = arith.constant 8 : index
    %65 = vector.load %arg24[%c0_62, %c0_63, %c8_64] : memref<1x8x32xbf16, #tpu.memory_space<vmem>>, vector<1x8x8xbf16>
    "tpu.trace_start"() <{level = 10 : i32, message = "bqd,bkd->bqk"}> : () -> ()
    %cst_65 = arith.constant dense<0.000000e+00> : vector<1x8x8xf32>
    %66 = tpu.matmul %63, %64, %cst_65 {dimension_numbers = #tpu.dot_dimension_numbers<[2], [2], [1], [1], [0, 0, 0, 1, 1, 1], [0], [0]>} : vector<1x8x8xbf16>, vector<1x8x8xbf16>, vector<1x8x8xf32> -> vector<1x8x8xf32>
    "tpu.trace_stop"() : () -> ()
    %67 = vector.broadcast %42 : vector<1x1x8xf32> to vector<1x8x8xf32>
    %68 = arith.addf %66, %67 : vector<1x8x8xf32>
    %cst_66 = arith.constant dense<0xFF800000> : vector<1x8xf32>
    %69 = vector.multi_reduction <maximumf>, %68, %cst_66 [2] : vector<1x8x8xf32> to vector<1x8xf32>
    %70 = vector.shape_cast %69 : vector<1x8xf32> to vector<1x8x1xf32>
    %71 = vector.broadcast %70 : vector<1x8x1xf32> to vector<1x8x8xf32>
    %72 = arith.subf %68, %71 : vector<1x8x8xf32>
    %73 = math.exp %72 : vector<1x8x8xf32>
    %cst_67 = arith.constant dense<0.000000e+00> : vector<1x8xf32>
    %74 = vector.multi_reduction <add>, %73, %cst_67 [2] : vector<1x8x8xf32> to vector<1x8xf32>
    %75 = vector.shape_cast %74 : vector<1x8xf32> to vector<1x8x1xf32>
    %76 = tpu.reciprocal %75 {approx = true} : vector<1x8x1xf32> -> vector<1x8x1xf32>
    %77 = vector.broadcast %76 : vector<1x8x1xf32> to vector<1x8x8xf32>
    %78 = arith.mulf %73, %77 : vector<1x8x8xf32>
    %79 = arith.truncf %78 : vector<1x8x8xf32> to vector<1x8x8xbf16>
    "tpu.trace_start"() <{level = 10 : i32, message = "bqk,bkd->bqd"}> : () -> ()
    %cst_68 = arith.constant dense<0.000000e+00> : vector<1x8x8xf32>
    %80 = tpu.matmul %79, %65, %cst_68 {dimension_numbers = #tpu.dot_dimension_numbers<[2], [1], [1], [2], [0, 0, 0, 1, 1, 2], [0], [0]>} : vector<1x8x8xbf16>, vector<1x8x8xbf16>, vector<1x8x8xf32> -> vector<1x8x8xf32>
    "tpu.trace_stop"() : () -> ()
    %81 = arith.truncf %80 : vector<1x8x8xf32> to vector<1x8x8xbf16>
    %c0_69 = arith.constant 0 : index
    %c0_70 = arith.constant 0 : index
    %c8_71 = arith.constant 8 : index
    %82 = vector.load %arg25[%c0_69, %c0_70, %c8_71] : memref<1x8x32xbf16, #tpu.memory_space<vmem>>, vector<1x8x8xbf16>
    tpu.vector_store %arg25[%c0_69, %c0_70, %c8_71], %81 {strides = array<i32>} : memref<1x8x32xbf16, #tpu.memory_space<vmem>>, vector<1x8x8xbf16>,
    %c0_72 = arith.constant 0 : index
    %c0_73 = arith.constant 0 : index
    %c16 = arith.constant 16 : index
    %83 = vector.load %arg22[%c0_72, %c0_73, %c16] : memref<1x8x32xbf16, #tpu.memory_space<vmem>>, vector<1x8x8xbf16>
    %c0_74 = arith.constant 0 : index
    %c0_75 = arith.constant 0 : index
    %c16_76 = arith.constant 16 : index
    %84 = vector.load %arg23[%c0_74, %c0_75, %c16_76] : memref<1x8x32xbf16, #tpu.memory_space<vmem>>, vector<1x8x8xbf16>
    %c0_77 = arith.constant 0 : index
    %c0_78 = arith.constant 0 : index
    %c16_79 = arith.constant 16 : index
    %85 = vector.load %arg24[%c0_77, %c0_78, %c16_79] : memref<1x8x32xbf16, #tpu.memory_space<vmem>>, vector<1x8x8xbf16>
    "tpu.trace_start"() <{level = 10 : i32, message = "bqd,bkd->bqk"}> : () -> ()
    %cst_80 = arith.constant dense<0.000000e+00> : vector<1x8x8xf32>
    %86 = tpu.matmul %83, %84, %cst_80 {dimension_numbers = #tpu.dot_dimension_numbers<[2], [2], [1], [1], [0, 0, 0, 1, 1, 1], [0], [0]>} : vector<1x8x8xbf16>, vector<1x8x8xbf16>, vector<1x8x8xf32> -> vector<1x8x8xf32>
    "tpu.trace_stop"() : () -> ()
    %87 = vector.broadcast %42 : vector<1x1x8xf32> to vector<1x8x8xf32>
    %88 = arith.addf %86, %87 : vector<1x8x8xf32>
    %cst_81 = arith.constant dense<0xFF800000> : vector<1x8xf32>
    %89 = vector.multi_reduction <maximumf>, %88, %cst_81 [2] : vector<1x8x8xf32> to vector<1x8xf32>
    %90 = vector.shape_cast %89 : vector<1x8xf32> to vector<1x8x1xf32>
    %91 = vector.broadcast %90 : vector<1x8x1xf32> to vector<1x8x8xf32>
    %92 = arith.subf %88, %91 : vector<1x8x8xf32>
    %93 = math.exp %92 : vector<1x8x8xf32>
    %cst_82 = arith.constant dense<0.000000e+00> : vector<1x8xf32>
    %94 = vector.multi_reduction <add>, %93, %cst_82 [2] : vector<1x8x8xf32> to vector<1x8xf32>
    %95 = vector.shape_cast %94 : vector<1x8xf32> to vector<1x8x1xf32>
    %96 = tpu.reciprocal %95 {approx = true} : vector<1x8x1xf32> -> vector<1x8x1xf32>
    %97 = vector.broadcast %96 : vector<1x8x1xf32> to vector<1x8x8xf32>
    %98 = arith.mulf %93, %97 : vector<1x8x8xf32>
    %99 = arith.truncf %98 : vector<1x8x8xf32> to vector<1x8x8xbf16>
    "tpu.trace_start"() <{level = 10 : i32, message = "bqk,bkd->bqd"}> : () -> ()
    %cst_83 = arith.constant dense<0.000000e+00> : vector<1x8x8xf32>
    %100 = tpu.matmul %99, %85, %cst_83 {dimension_numbers = #tpu.dot_dimension_numbers<[2], [1], [1], [2], [0, 0, 0, 1, 1, 2], [0], [0]>} : vector<1x8x8xbf16>, vector<1x8x8xbf16>, vector<1x8x8xf32> -> vector<1x8x8xf32>
    "tpu.trace_stop"() : () -> ()
    %101 = arith.truncf %100 : vector<1x8x8xf32> to vector<1x8x8xbf16>
    %c0_84 = arith.constant 0 : index
    %c0_85 = arith.constant 0 : index
    %c16_86 = arith.constant 16 : index
    %102 = vector.load %arg25[%c0_84, %c0_85, %c16_86] : memref<1x8x32xbf16, #tpu.memory_space<vmem>>, vector<1x8x8xbf16>
    tpu.vector_store %arg25[%c0_84, %c0_85, %c16_86], %101 {strides = array<i32>} : memref<1x8x32xbf16, #tpu.memory_space<vmem>>, vector<1x8x8xbf16>,
    %c0_87 = arith.constant 0 : index
    %c0_88 = arith.constant 0 : index
    %c24 = arith.constant 24 : index
    %103 = vector.load %arg22[%c0_87, %c0_88, %c24] : memref<1x8x32xbf16, #tpu.memory_space<vmem>>, vector<1x8x8xbf16>
    %c0_89 = arith.constant 0 : index
    %c0_90 = arith.constant 0 : index
    %c24_91 = arith.constant 24 : index
    %104 = vector.load %arg23[%c0_89, %c0_90, %c24_91] : memref<1x8x32xbf16, #tpu.memory_space<vmem>>, vector<1x8x8xbf16>
    %c0_92 = arith.constant 0 : index
    %c0_93 = arith.constant 0 : index
    %c24_94 = arith.constant 24 : index
    %105 = vector.load %arg24[%c0_92, %c0_93, %c24_94] : memref<1x8x32xbf16, #tpu.memory_space<vmem>>, vector<1x8x8xbf16>
    "tpu.trace_start"() <{level = 10 : i32, message = "bqd,bkd->bqk"}> : () -> ()
    %cst_95 = arith.constant dense<0.000000e+00> : vector<1x8x8xf32>
    %106 = tpu.matmul %103, %104, %cst_95 {dimension_numbers = #tpu.dot_dimension_numbers<[2], [2], [1], [1], [0, 0, 0, 1, 1, 1], [0], [0]>} : vector<1x8x8xbf16>, vector<1x8x8xbf16>, vector<1x8x8xf32> -> vector<1x8x8xf32>
    "tpu.trace_stop"() : () -> ()
    %107 = vector.broadcast %42 : vector<1x1x8xf32> to vector<1x8x8xf32>
    %108 = arith.addf %106, %107 : vector<1x8x8xf32>
    %cst_96 = arith.constant dense<0xFF800000> : vector<1x8xf32>
    %109 = vector.multi_reduction <maximumf>, %108, %cst_96 [2] : vector<1x8x8xf32> to vector<1x8xf32>
    %110 = vector.shape_cast %109 : vector<1x8xf32> to vector<1x8x1xf32>
    %111 = vector.broadcast %110 : vector<1x8x1xf32> to vector<1x8x8xf32>
    %112 = arith.subf %108, %111 : vector<1x8x8xf32>
    %113 = math.exp %112 : vector<1x8x8xf32>
    %cst_97 = arith.constant dense<0.000000e+00> : vector<1x8xf32>
    %114 = vector.multi_reduction <add>, %113, %cst_97 [2] : vector<1x8x8xf32> to vector<1x8xf32>
    %115 = vector.shape_cast %114 : vector<1x8xf32> to vector<1x8x1xf32>
    %116 = tpu.reciprocal %115 {approx = true} : vector<1x8x1xf32> -> vector<1x8x1xf32>
    %117 = vector.broadcast %116 : vector<1x8x1xf32> to vector<1x8x8xf32>
    %118 = arith.mulf %113, %117 : vector<1x8x8xf32>
    %119 = arith.truncf %118 : vector<1x8x8xf32> to vector<1x8x8xbf16>
    "tpu.trace_start"() <{level = 10 : i32, message = "bqk,bkd->bqd"}> : () -> ()
    %cst_98 = arith.constant dense<0.000000e+00> : vector<1x8x8xf32>
    %120 = tpu.matmul %119, %105, %cst_98 {dimension_numbers = #tpu.dot_dimension_numbers<[2], [1], [1], [2], [0, 0, 0, 1, 1, 2], [0], [0]>} : vector<1x8x8xbf16>, vector<1x8x8xbf16>, vector<1x8x8xf32> -> vector<1x8x8xf32>
    "tpu.trace_stop"() : () -> ()
    %121 = arith.truncf %120 : vector<1x8x8xf32> to vector<1x8x8xbf16>
    %c0_99 = arith.constant 0 : index
    %c0_100 = arith.constant 0 : index
    %c24_101 = arith.constant 24 : index
    %122 = vector.load %arg25[%c0_99, %c0_100, %c24_101] : memref<1x8x32xbf16, #tpu.memory_space<vmem>>, vector<1x8x8xbf16>
    tpu.vector_store %arg25[%c0_99, %c0_100, %c24_101], %121 {strides = array<i32>} : memref<1x8x32xbf16, #tpu.memory_space<vmem>>, vector<1x8x8xbf16>,
    %c0_102 = arith.constant 0 : index
    %c0_103 = arith.constant 0 : index
    %c0_104 = arith.constant 0 : index
    %123 = vector.load %arg25[%c0_102, %c0_103, %c0_104] : memref<1x8x32xbf16, #tpu.memory_space<vmem>>, vector<1x8x32xbf16>
    %124 = vector.shape_cast %123 : vector<1x8x32xbf16> to vector<8x32xbf16>
    %c0_105 = arith.constant 0 : index
    %c0_106 = arith.constant 0 : index
    %c0_107 = arith.constant 0 : index
    %125 = vector.load %arg10[%c0_105, %c0_106, %c0_107] : memref<1x32x32xbf16, #tpu.memory_space<vmem>>, vector<1x32x32xbf16>
    %126 = vector.shape_cast %125 : vector<1x32x32xbf16> to vector<32x32xbf16>
    %cst_108 = arith.constant dense<0.000000e+00> : vector<8x32xf32>
    %127 = tpu.matmul %124, %126, %cst_108 {dimension_numbers = #tpu.dot_dimension_numbers<[1], [0], [0], [1], [0, 0, 1, 1], [], []>} : vector<8x32xbf16>, vector<32x32xbf16>, vector<8x32xf32> -> vector<8x32xf32>
    %c0_109 = arith.constant 0 : index
    %c0_110 = arith.constant 0 : index
    %c0_111 = arith.constant 0 : index
    %128 = vector.load %arg11[%c0_109, %c0_110, %c0_111] : memref<1x1x32xf32, #tpu.memory_space<vmem>>, vector<1x1x32xf32>
    %129 = vector.shape_cast %128 : vector<1x1x32xf32> to vector<1x32xf32>
    %130 = vector.broadcast %129 : vector<1x32xf32> to vector<8x32xf32>
    %131 = arith.addf %127, %130 : vector<8x32xf32>
    %c0_112 = arith.constant 0 : index
    %c0_113 = arith.constant 0 : index
    %c0_114 = arith.constant 0 : index
    %132 = vector.load %arg21[%c0_112, %c0_113, %c0_114] : memref<1x8x32xf32, #tpu.memory_space<vmem>>, vector<1x8x32xf32>
    %133 = vector.shape_cast %132 : vector<1x8x32xf32> to vector<8x32xf32>
    %134 = arith.addf %133, %131 : vector<8x32xf32>
    %c0_115 = arith.constant 0 : index
    %c0_116 = arith.constant 0 : index
    %c0_117 = arith.constant 0 : index
    %135 = vector.load %arg12[%c0_115, %c0_116, %c0_117] : memref<1x1x32xf32, #tpu.memory_space<vmem>>, vector<1x1x32xf32>
    %136 = vector.shape_cast %135 : vector<1x1x32xf32> to vector<1x32xf32>
    %c0_118 = arith.constant 0 : index
    %c0_119 = arith.constant 0 : index
    %c0_120 = arith.constant 0 : index
    %137 = vector.load %arg13[%c0_118, %c0_119, %c0_120] : memref<1x1x32xf32, #tpu.memory_space<vmem>>, vector<1x1x32xf32>
    %138 = vector.shape_cast %137 : vector<1x1x32xf32> to vector<1x32xf32>
    %cst_121 = arith.constant dense<0.000000e+00> : vector<8xf32>
    %139 = vector.multi_reduction <add>, %134, %cst_121 [1] : vector<8x32xf32> to vector<8xf32>
    %140 = vector.shape_cast %139 : vector<8xf32> to vector<8x1xf32>
    %cst_122 = arith.constant 3.200000e+01 : f32
    %141 = vector.broadcast %cst_122 : f32 to vector<8x1xf32>
    %142 = arith.divf %140, %141 : vector<8x1xf32>
    %143 = vector.broadcast %142 : vector<8x1xf32> to vector<8x32xf32>
    %144 = arith.subf %134, %143 : vector<8x32xf32>
    %145 = arith.mulf %144, %144 : vector<8x32xf32>
    %cst_123 = arith.constant dense<0.000000e+00> : vector<8xf32>
    %146 = vector.multi_reduction <add>, %145, %cst_123 [1] : vector<8x32xf32> to vector<8xf32>
    %147 = vector.shape_cast %146 : vector<8xf32> to vector<8x1xf32>
    %cst_124 = arith.constant 3.200000e+01 : f32
    %148 = vector.broadcast %cst_124 : f32 to vector<8x1xf32>
    %149 = arith.divf %147, %148 : vector<8x1xf32>
    %150 = vector.broadcast %142 : vector<8x1xf32> to vector<8x32xf32>
    %151 = arith.subf %134, %150 : vector<8x32xf32>
    %cst_125 = arith.constant 9.99999996E-13 : f32
    %152 = vector.broadcast %cst_125 : f32 to vector<8x1xf32>
    %153 = arith.addf %149, %152 : vector<8x1xf32>
    %154 = math.rsqrt %153 : vector<8x1xf32>
    %155 = vector.broadcast %154 : vector<8x1xf32> to vector<8x32xf32>
    %156 = arith.mulf %151, %155 : vector<8x32xf32>
    %157 = vector.broadcast %136 : vector<1x32xf32> to vector<8x32xf32>
    %158 = arith.mulf %156, %157 : vector<8x32xf32>
    %159 = vector.broadcast %138 : vector<1x32xf32> to vector<8x32xf32>
    %160 = arith.addf %158, %159 : vector<8x32xf32>
    %161 = arith.truncf %160 : vector<8x32xf32> to vector<8x32xbf16>
    %c0_126 = arith.constant 0 : index
    %c0_127 = arith.constant 0 : index
    %c0_128 = arith.constant 0 : index
    %162 = vector.load %arg14[%c0_126, %c0_127, %c0_128] : memref<1x32x64xbf16, #tpu.memory_space<vmem>>, vector<1x32x64xbf16>
    %163 = vector.shape_cast %162 : vector<1x32x64xbf16> to vector<32x64xbf16>
    %cst_129 = arith.constant dense<0.000000e+00> : vector<8x64xf32>
    %164 = tpu.matmul %161, %163, %cst_129 {dimension_numbers = #tpu.dot_dimension_numbers<[1], [0], [0], [1], [0, 0, 1, 1], [], []>} : vector<8x32xbf16>, vector<32x64xbf16>, vector<8x64xf32> -> vector<8x64xf32>
    %c0_130 = arith.constant 0 : index
    %c0_131 = arith.constant 0 : index
    %c0_132 = arith.constant 0 : index
    %165 = vector.load %arg15[%c0_130, %c0_131, %c0_132] : memref<1x1x64xf32, #tpu.memory_space<vmem>>, vector<1x1x64xf32>
    %166 = vector.shape_cast %165 : vector<1x1x64xf32> to vector<1x64xf32>
    %167 = vector.broadcast %166 : vector<1x64xf32> to vector<8x64xf32>
    %168 = arith.addf %164, %167 : vector<8x64xf32>
    %cst_133 = arith.constant 5.000000e-01 : f32
    %169 = vector.broadcast %cst_133 : f32 to vector<8x64xf32>
    %170 = arith.mulf %169, %168 : vector<8x64xf32>
    %cst_134 = arith.constant 4.471500e-02 : f32
    %171 = vector.broadcast %cst_134 : f32 to vector<8x64xf32>
    %172 = arith.mulf %171, %168 : vector<8x64xf32>
    %173 = arith.mulf %172, %168 : vector<8x64xf32>
    %174 = arith.mulf %173, %168 : vector<8x64xf32>
    %175 = arith.addf %168, %174 : vector<8x64xf32>
    %cst_135 = arith.constant 0.797884583 : f32
    %176 = vector.broadcast %cst_135 : f32 to vector<8x64xf32>
    %177 = arith.mulf %176, %175 : vector<8x64xf32>
    %178 = math.tanh %177 : vector<8x64xf32>
    %cst_136 = arith.constant 1.000000e+00 : f32
    %179 = vector.broadcast %cst_136 : f32 to vector<8x64xf32>
    %180 = arith.addf %179, %178 : vector<8x64xf32>
    %181 = arith.mulf %170, %180 : vector<8x64xf32>
    %182 = arith.truncf %181 : vector<8x64xf32> to vector<8x64xbf16>
    %c0_137 = arith.constant 0 : index
    %c0_138 = arith.constant 0 : index
    %c0_139 = arith.constant 0 : index
    %183 = vector.load %arg16[%c0_137, %c0_138, %c0_139] : memref<1x64x32xbf16, #tpu.memory_space<vmem>>, vector<1x64x32xbf16>
    %184 = vector.shape_cast %183 : vector<1x64x32xbf16> to vector<64x32xbf16>
    %cst_140 = arith.constant dense<0.000000e+00> : vector<8x32xf32>
    %185 = tpu.matmul %182, %184, %cst_140 {dimension_numbers = #tpu.dot_dimension_numbers<[1], [0], [0], [1], [0, 0, 1, 1], [], []>} : vector<8x64xbf16>, vector<64x32xbf16>, vector<8x32xf32> -> vector<8x32xf32>
    %c0_141 = arith.constant 0 : index
    %c0_142 = arith.constant 0 : index
    %c0_143 = arith.constant 0 : index
    %186 = vector.load %arg17[%c0_141, %c0_142, %c0_143] : memref<1x1x32xf32, #tpu.memory_space<vmem>>, vector<1x1x32xf32>
    %187 = vector.shape_cast %186 : vector<1x1x32xf32> to vector<1x32xf32>
    %188 = vector.broadcast %187 : vector<1x32xf32> to vector<8x32xf32>
    %189 = arith.addf %185, %188 : vector<8x32xf32>
    %190 = arith.addf %160, %189 : vector<8x32xf32>
    %c0_144 = arith.constant 0 : index
    %c0_145 = arith.constant 0 : index
    %c0_146 = arith.constant 0 : index
    %191 = vector.load %arg18[%c0_144, %c0_145, %c0_146] : memref<1x1x32xf32, #tpu.memory_space<vmem>>, vector<1x1x32xf32>
    %192 = vector.shape_cast %191 : vector<1x1x32xf32> to vector<1x32xf32>
    %c0_147 = arith.constant 0 : index
    %c0_148 = arith.constant 0 : index
    %c0_149 = arith.constant 0 : index
    %193 = vector.load %arg19[%c0_147, %c0_148, %c0_149] : memref<1x1x32xf32, #tpu.memory_space<vmem>>, vector<1x1x32xf32>
    %194 = vector.shape_cast %193 : vector<1x1x32xf32> to vector<1x32xf32>
    %cst_150 = arith.constant dense<0.000000e+00> : vector<8xf32>
    %195 = vector.multi_reduction <add>, %190, %cst_150 [1] : vector<8x32xf32> to vector<8xf32>
    %196 = vector.shape_cast %195 : vector<8xf32> to vector<8x1xf32>
    %cst_151 = arith.constant 3.200000e+01 : f32
    %197 = vector.broadcast %cst_151 : f32 to vector<8x1xf32>
    %198 = arith.divf %196, %197 : vector<8x1xf32>
    %199 = vector.broadcast %198 : vector<8x1xf32> to vector<8x32xf32>
    %200 = arith.subf %190, %199 : vector<8x32xf32>
    %201 = arith.mulf %200, %200 : vector<8x32xf32>
    %cst_152 = arith.constant dense<0.000000e+00> : vector<8xf32>
    %202 = vector.multi_reduction <add>, %201, %cst_152 [1] : vector<8x32xf32> to vector<8xf32>
    %203 = vector.shape_cast %202 : vector<8xf32> to vector<8x1xf32>
    %cst_153 = arith.constant 3.200000e+01 : f32
    %204 = vector.broadcast %cst_153 : f32 to vector<8x1xf32>
    %205 = arith.divf %203, %204 : vector<8x1xf32>
    %206 = vector.broadcast %198 : vector<8x1xf32> to vector<8x32xf32>
    %207 = arith.subf %190, %206 : vector<8x32xf32>
    %cst_154 = arith.constant 9.99999996E-13 : f32
    %208 = vector.broadcast %cst_154 : f32 to vector<8x1xf32>
    %209 = arith.addf %205, %208 : vector<8x1xf32>
    %210 = math.rsqrt %209 : vector<8x1xf32>
    %211 = vector.broadcast %210 : vector<8x1xf32> to vector<8x32xf32>
    %212 = arith.mulf %207, %211 : vector<8x32xf32>
    %213 = vector.broadcast %192 : vector<1x32xf32> to vector<8x32xf32>
    %214 = arith.mulf %212, %213 : vector<8x32xf32>
    %215 = vector.broadcast %194 : vector<1x32xf32> to vector<8x32xf32>
    %216 = arith.addf %214, %215 : vector<8x32xf32>
    %217 = vector.shape_cast %216 : vector<8x32xf32> to vector<1x8x32xf32>
    %c0_155 = arith.constant 0 : index
    %c0_156 = arith.constant 0 : index
    %c0_157 = arith.constant 0 : index
    %218 = vector.load %arg21[%c0_155, %c0_156, %c0_157] : memref<1x8x32xf32, #tpu.memory_space<vmem>>, vector<1x8x32xf32>
    tpu.vector_store %arg21[%c0_155, %c0_156, %c0_157], %217 {strides = array<i32>} : memref<1x8x32xf32, #tpu.memory_space<vmem>>, vector<1x8x32xf32>,
    %c1_i32 = arith.constant 1 : i32
    %219 = arith.cmpi eq, %arg1, %c1_i32 : i32
    %220 = arith.extui %219 : i1 to i32
    %c0_i32_158 = arith.constant 0 : i32
    %221 = arith.cmpi ne, %220, %c0_i32_158 : i32
    scf.if %221 {
      %222 = vector.shape_cast %216 : vector<8x32xf32> to vector<1x8x32xf32>
      %223 = vector.extract_strided_slice %222 {offsets = [0, 0, 0], sizes = [1, 1, 32], strides = [1, 1, 1]} : vector<1x8x32xf32> to vector<1x1x32xf32>
      %c0_159 = arith.constant 0 : index
      %c0_160 = arith.constant 0 : index
      %c0_161 = arith.constant 0 : index
      %224 = vector.load %arg20[%c0_159, %c0_160, %c0_161] : memref<1x1x32xf32, #tpu.memory_space<vmem>>, vector<1x1x32xf32>
      tpu.vector_store %arg20[%c0_159, %c0_160, %c0_161], %223 {strides = array<i32>} : memref<1x1x32xf32, #tpu.memory_space<vmem>>, vector<1x1x32xf32>,
    } else {
    }
    return
  }
  func.func @transform_0(%arg0: i32, %arg1: i32) -> (i32, i32, i32) {
    %c0_i32 = arith.constant 0 : i32
    %c0_i32_0 = arith.constant 0 : i32
    %c0_i32_1 = arith.constant 0 : i32
    return %arg0, %c0_i32, %c0_i32_0 : i32, i32, i32
  }
  func.func @transform_1(%arg0: i32, %arg1: i32) -> (i32, i32, i32) {
    %c0_i32 = arith.constant 0 : i32
    %c0_i32_0 = arith.constant 0 : i32
    %c0_i32_1 = arith.constant 0 : i32
    return %arg0, %c0_i32, %c0_i32_0 : i32, i32, i32
  }
  func.func @transform_2(%arg0: i32, %arg1: i32) -> (i32, i32, i32) {
    %c0_i32 = arith.constant 0 : i32
    %c0_i32_0 = arith.constant 0 : i32
    %c0_i32_1 = arith.constant 0 : i32
    return %arg1, %c0_i32, %c0_i32_0 : i32, i32, i32
  }
  func.func @transform_3(%arg0: i32, %arg1: i32) -> (i32, i32, i32) {
    %c0_i32 = arith.constant 0 : i32
    %c0_i32_0 = arith.constant 0 : i32
    %c0_i32_1 = arith.constant 0 : i32
    return %arg1, %c0_i32, %c0_i32_0 : i32, i32, i32
  }
  func.func @transform_4(%arg0: i32, %arg1: i32) -> (i32, i32, i32) {
    %c0_i32 = arith.constant 0 : i32
    %c0_i32_0 = arith.constant 0 : i32
    %c0_i32_1 = arith.constant 0 : i32
    return %arg1, %c0_i32, %c0_i32_0 : i32, i32, i32
  }
  func.func @transform_5(%arg0: i32, %arg1: i32) -> (i32, i32, i32) {
    %c0_i32 = arith.constant 0 : i32
    %c0_i32_0 = arith.constant 0 : i32
    %c0_i32_1 = arith.constant 0 : i32
    return %arg1, %c0_i32, %c0_i32_0 : i32, i32, i32
  }
  func.func @transform_6(%arg0: i32, %arg1: i32) -> (i32, i32, i32) {
    %c0_i32 = arith.constant 0 : i32
    %c0_i32_0 = arith.constant 0 : i32
    %c0_i32_1 = arith.constant 0 : i32
    return %arg1, %c0_i32, %c0_i32_0 : i32, i32, i32
  }
  func.func @transform_7(%arg0: i32, %arg1: i32) -> (i32, i32, i32) {
    %c0_i32 = arith.constant 0 : i32
    %c0_i32_0 = arith.constant 0 : i32
    %c0_i32_1 = arith.constant 0 : i32
    return %arg1, %c0_i32, %c0_i32_0 : i32, i32, i32
  }
  func.func @transform_8(%arg0: i32, %arg1: i32) -> (i32, i32, i32) {
    %c0_i32 = arith.constant 0 : i32
    %c0_i32_0 = arith.constant 0 : i32
    %c0_i32_1 = arith.constant 0 : i32
    return %arg1, %c0_i32, %c0_i32_0 : i32, i32, i32
  }
  func.func @transform_9(%arg0: i32, %arg1: i32) -> (i32, i32, i32) {
    %c0_i32 = arith.constant 0 : i32
    %c0_i32_0 = arith.constant 0 : i32
    %c0_i32_1 = arith.constant 0 : i32
    return %arg1, %c0_i32, %c0_i32_0 : i32, i32, i32
  }
  func.func @transform_10(%arg0: i32, %arg1: i32) -> (i32, i32, i32) {
    %c0_i32 = arith.constant 0 : i32
    %c0_i32_0 = arith.constant 0 : i32
    %c0_i32_1 = arith.constant 0 : i32
    return %arg1, %c0_i32, %c0_i32_0 : i32, i32, i32
  }
  func.func @transform_11(%arg0: i32, %arg1: i32) -> (i32, i32, i32) {
    %c0_i32 = arith.constant 0 : i32
    %c0_i32_0 = arith.constant 0 : i32
    %c0_i32_1 = arith.constant 0 : i32
    return %arg1, %c0_i32, %c0_i32_0 : i32, i32, i32
  }
  func.func @transform_12(%arg0: i32, %arg1: i32) -> (i32, i32, i32) {
    %c0_i32 = arith.constant 0 : i32
    %c0_i32_0 = arith.constant 0 : i32
    %c0_i32_1 = arith.constant 0 : i32
    return %arg1, %c0_i32, %c0_i32_0 : i32, i32, i32
  }
  func.func @transform_13(%arg0: i32, %arg1: i32) -> (i32, i32, i32) {
    %c0_i32 = arith.constant 0 : i32
    %c0_i32_0 = arith.constant 0 : i32
    %c0_i32_1 = arith.constant 0 : i32
    return %arg1, %c0_i32, %c0_i32_0 : i32, i32, i32
  }
  func.func @transform_14(%arg0: i32, %arg1: i32) -> (i32, i32, i32) {
    %c0_i32 = arith.constant 0 : i32
    %c0_i32_0 = arith.constant 0 : i32
    %c0_i32_1 = arith.constant 0 : i32
    return %arg1, %c0_i32, %c0_i32_0 : i32, i32, i32
  }
  func.func @transform_15(%arg0: i32, %arg1: i32) -> (i32, i32, i32) {
    %c0_i32 = arith.constant 0 : i32
    %c0_i32_0 = arith.constant 0 : i32
    %c0_i32_1 = arith.constant 0 : i32
    return %arg1, %c0_i32, %c0_i32_0 : i32, i32, i32
  }
  func.func @transform_16(%arg0: i32, %arg1: i32) -> (i32, i32, i32) {
    %c0_i32 = arith.constant 0 : i32
    %c0_i32_0 = arith.constant 0 : i32
    %c0_i32_1 = arith.constant 0 : i32
    return %arg1, %c0_i32, %c0_i32_0 : i32, i32, i32
  }
  func.func @transform_17(%arg0: i32, %arg1: i32) -> (i32, i32, i32) {
    %c0_i32 = arith.constant 0 : i32
    %c0_i32_0 = arith.constant 0 : i32
    %c0_i32_1 = arith.constant 0 : i32
    return %arg1, %c0_i32, %c0_i32_0 : i32, i32, i32
  }
  func.func @transform_18(%arg0: i32, %arg1: i32) -> (i32, i32, i32) {
    %c0_i32 = arith.constant 0 : i32
    %c0_i32_0 = arith.constant 0 : i32
    %c0_i32_1 = arith.constant 0 : i32
    return %arg0, %c0_i32, %c0_i32_0 : i32, i32, i32
  }
}

</mosaic_0001>

<bundles_post_ra>
// kernel: tpu_custom_call.1
= control target key start
LH: loop header
LB: loop body
LE: loop exit
PB: predicated region body
PF: predicated region fallthrough
CT: control target
= control target key end

     0   :  { %s3544_s0 = inlined_call_operand.hbm [shape: f32[2,8,32], index: 0, kind: input, shape index: {}]   ;;  %s3545_s1 = inlined_call_operand.vmem [shape: f32[2,1,8], index: 1, kind: input, shape index: {}]   ;;  %s3546_s2 = inlined_call_operand.vmem [shape: bf16[2,32,32], index: 2, kind: input, shape index: {}]   ;;  %s3547_s3 = inlined_call_operand.vmem [shape: f32[2,1,32], index: 3, kind: input, shape index: {}]   ;;  %s3548_s4 = inlined_call_operand.vmem [shape: bf16[2,32,32], index: 4, kind: input, shape index: {}]   ;;  %s3549_s5 = inlined_call_operand.vmem [shape: f32[2,1,32], index: 5, kind: input, shape index: {}]   ;;  %s3550_s6 = inlined_call_operand.vmem [shape: bf16[2,32,32], index: 6, kind: input, shape index: {}]   ;;  %s3551_s7 = inlined_call_operand.vmem [shape: f32[2,1,32], index: 7, kind: input, shape index: {}]   ;;  %s3552_s8 = inlined_call_operand.hbm [shape: bf16[2,32,32], index: 8, kind: input, shape index: {}]   ;;  %s3553_s9 = inlined_call_operand.vmem [shape: f32[2,1,32], index: 9, kind: input, shape index: {}]   ;;  %s3554_s10 = inlined_call_operand.vmem [shape: f32[2,1,32], index: 10, kind: input, shape index: {}]   ;;  %s3555_s11 = inlined_call_operand.vmem [shape: f32[2,1,32], index: 11, kind: input, shape index: {}]   ;;  %s3556_s12 = inlined_call_operand.hbm [shape: bf16[2,32,64], index: 12, kind: input, shape index: {}]   ;;  %s3557_s13 = inlined_call_operand.vmem [shape: f32[2,1,64], index: 13, kind: input, shape index: {}]   ;;  %s3558_s14 = inlined_call_operand.vmem [shape: bf16[2,64,32], index: 14, kind: input, shape index: {}]   ;;  %s3559_s15 = inlined_call_operand.vmem [shape: f32[2,1,32], index: 15, kind: input, shape index: {}]   ;;  %s3560_s16 = inlined_call_operand.vmem [shape: f32[2,1,32], index: 16, kind: input, shape index: {}]   ;;  %s3561_s17 = inlined_call_operand.vmem [shape: f32[2,1,32], index: 17, kind: input, shape index: {}]   ;;  %s3562_s18 = inlined_call_operand.hbm [shape: f32[2,1,32], index: 18, kind: output, shape index: {}]  }
   0x1   :  { %3590 = sst [smem:[#allocation32_spill]] %s3544_s0 }
   0x2   :  { %3591 = sst [smem:[#allocation33_spill]] %s3545_s1 }
   0x3   :  { %3592 = sst [smem:[#allocation34_spill]] %s3546_s2 }
   0x4   :  { %3593 = sst [smem:[#allocation35_spill]] %s3547_s3 }
   0x5   :  { %3594 = sst [smem:[#allocation36_spill]] %s3548_s4 }
   0x6   :  { %3595 = sst [smem:[#allocation37_spill]] %s3549_s5 }
   0x7   :  { %3596 = sst [smem:[#allocation38_spill]] %s3550_s6 }
   0x8   :  { %3597 = sst [smem:[#allocation39_spill]] %s3551_s7 }
   0x9   :  { %3598 = sst [smem:[#allocation40_spill]] %s3552_s8 }
   0xa   :  { %3599 = sst [smem:[#allocation41_spill]] %s3553_s9 }
   0xb   :  { %3600 = sst [smem:[#allocation42_spill]] %s3554_s10 }
   0xc   :  { %3601 = sst [smem:[#allocation43_spill]] %s3555_s11 }
   0xd   :  { %3602 = sst [smem:[#allocation44_spill]] %s3556_s12 }
   0xe   :  { %3603 = sst [smem:[#allocation45_spill]] %s3557_s13 }
   0xf   :  { %3604 = sst [smem:[#allocation46_spill]] %s3558_s14 }
  0x10   :  { %3605 = sst [smem:[#allocation47_spill]] %s3559_s15 }
  0x11   :  { %3606 = sst [smem:[#allocation48_spill]] %s3560_s16 }
  0x12   :  { %3607 = sst [smem:[#allocation49_spill]] %s3561_s17 }
  0x13   :  { %3608 = sst [smem:[#allocation50_spill]] %s3562_s18 }
  0x14   :  { %23 = vsyncpa [#allocation8], 0 }
  0x15   :  { %25 = vsyncpa [#allocation8 + $0x1], 0 }
  0x16   :  { %26 = vsyncpa [#allocation11], 0 }
  0x17   :  { %28 = vsyncpa [#allocation11 + $0x1], 0 }
  0x18   :  { %29 = vsyncpa [#allocation9], 0 }
  0x19   :  { %31 = vsyncpa [#allocation9 + $0x1], 0  ;;  %s2940_s27 = smov 0   ;;  %s2942_s28 = smov 0  }
  0x1a   :  { %s2944_s29 = smov 0   ;;  %s2946_s30 = smov 0  }
  0x1b   :  { %s2948_s0 = smov 0   ;;  %s2950_s19 = smov 0  }
  0x1c   :  { %s2952_s1 = smov 0   ;;  %s2954_s20 = smov 0  }
  0x1d   :  { %s2956_s21 = smov 0   ;;  %s2958_s22 = smov 0  }
  0x1e   :  { %s2960_s2 = smov 0  }
  0x1f LB: > { %3609 = sst [smem:[#allocation17_spill]] %s2793_s28  ;;  %s46_s23 = sadd.s32 1, %s2821_s21  ;;  %s2829_s2 = sphi %s2960_s2, %s37_s2   ;;  %s2825_s22 = sphi %s2958_s22, %s3697_s22   ;;  %s2821_s21 = sphi %s2956_s21, %s3696_s21   ;;  %s2817_s20 = sphi %s2954_s20, %s3695_s20   ;;  %s2813_s1 = sphi %s2952_s1, %s3694_s1   ;;  %s2809_s19 = sphi %s2950_s19, %s3693_s19   ;;  %s2805_s0 = sphi %s2948_s0, %s3692_s0   ;;  %s2801_s30 = sphi %s2946_s30, %s3691_s30   ;;  %s2797_s29 = sphi %s2944_s29, %s3690_s29   ;;  %s2793_s28 = sphi %s2942_s28, %s3689_s28   ;;  %s2789_s27 = sphi %s2940_s27, %s3688_s27  }
  0x20   : > { %3610 = sst [smem:[#allocation18_spill]] %s2797_s29  ;;  %p3569_p0 = scmp.eq.s32.totalorder %s2829_s2, 0 }
  0x21   : > { %3611 = sst [smem:[#allocation19_spill]] %s2801_s30  ;;  %p2997_p1 = scmp.ge.s32.totalorder %s46_s23, 2 }
  0x22   : > { %3612 = sst [smem:[#allocation20_spill]] %s2805_s0  ;;  %s264_s25 = sadd.s32 1, %s2797_s29 }
  0x23   : > { %3613 = sst [smem:[#allocation21_spill]] %s2809_s19  ;;  %p271_p2 = scmp.ne.s32.totalorder %s2797_s29, %s2793_s28 }
  0x24   : > { %3614 = sst [smem:[#allocation22_spill]] %s2817_s20  ;;  %s3699_s23 = smov (%p2997_p1, %s46_s23), 0 }
  0x25   : > { %3615 = sst [smem:[#allocation23_spill]] %s2821_s21  ;;  %p273_p3 = por %p271_p2, %p3569_p0 }
  0x26   : > { %3616 = sst [smem:[#allocation24_spill]] %s2825_s22  ;;  %s261_s26 = ssub.s32 %s2821_s21, %s3699_s23 }
  0x27   : > { %3617 = sst [smem:[#allocation25_spill]] %s2829_s2  ;;  %p3568_p4 = scmp.lt.s32.totalorder %s2829_s2, 4 }
  0x28   : > { %3619 = sst [smem:[#allocation26_spill]] %s3699_s23  ;;  %p262_p5 = scmp.eq.s32.totalorder %s261_s26, 0 }
  0x29   : > { %s627_s18 = sand.u32 1, %s2829_s2   ;;  %s629_s17 = sand.u32 1, %s2797_s29  }
  0x2a   : > { %s3016_s16 = scalar_select %p262_p5, %s2797_s29, %s264_s25  }
  0x2b   : > { %s3018_s15 = sshll.u32 %s629_s17, 4  ;;  %s3566_s14 = sshll.u32 %s2821_s21, 8 }
  0x2c   : > { %3620 = sst [smem:[#allocation27_spill]] %s3016_s16  ;;  %s3621_s8 = sld [smem:[#allocation40_spill]] }
  0x2d   : > { %s631_s23 = scalar_lea.vmem [#allocation10], %s3018_s15  ;;  %p3031_p6 = pnand %p3568_p4, %p273_p3 }
  0x2e   : > { %s638_s26 = sshll.u32 %s631_s23, 4  ;;  %s3037_s17 = scalar_lea.sflag [#allocation11], %s627_s18  ;;  %s3035_s26 = int_to_ptr.vmem [resolvable:$true] %s638_s26 }
  0x2f   : > { %p3570_p8 = pneg %p3031_p6 }
  0x32   : > { %s3026_s10 = scalar_lea.hbm %s3621_s8, %s3566_s14  ;;  %s2618_s14 = scalar_lea.hbm %s3621_s8, 512 }
  0x33   : > { %s2613_s11 = scalar_lea.hbm %s3026_s10, 256  ;;  %p2619_p11 = scmp.lt.u32.totalorder %s3026_s10, %s3621_s8 }
  0x34   : > { %p2614_p7 = scmp.ne.s32.totalorder %s3026_s10, %s2613_s11  ;;  %p2620_p12 = scmp.lt.u32.totalorder %s2618_s14, %s2613_s11 }
  0x35   : > { %p2622_p2 = scmp.lt.u32.totalorder %s2613_s11, %s3026_s10 }
  0x36   : > { %p2616_p9 = pnand %p3570_p8, %p2614_p7  ;;  %p2621_p13 = por %p2620_p12, %p2619_p11 }
  0x38   : > { %p2617_p10 = pneg %p2616_p9  ;;  %p2623_p3 = por %p2622_p2, %p2621_p13 }
  0x3a   : > { %p2624_p5 = pnand %p2623_p3, %p2617_p10 }
  0x3c   : > { %2627 = shalt.err (!%p2624_p5)
}
  0x3d   : > { %s2628_s18 = scalar_lea.vmem %s3035_s26, 256  ;;  %s2831_s13 = smov [#allocation10]  }
  0x3e   : > { %p2629_p7 = scmp.ne.s32.totalorder %s3035_s26, %s2628_s18  ;;  %s2633_s23 = sshll.u32 %s2831_s13, 4  ;;  %s2634_s23 = int_to_ptr.vmem [resolvable:$false] %s2633_s23 }
  0x3f   : > { %s2635_s16 = scalar_lea.vmem %s2634_s23, 512  ;;  %p2636_p0 = scmp.lt.s32.totalorder %s3035_s26, %s2634_s23 }
  0x40   : > { %p2631_p9 = pnand %p2629_p7, %p3570_p8  ;;  %p2637_p11 = scmp.lt.s32.totalorder %s2635_s16, %s2628_s18 }
  0x42   : > { %p2632_p4 = pneg %p2631_p9  ;;  %p2638_p12 = por %p2637_p11, %p2636_p0 }
  0x44   : > { %p2639_p13 = pnand %p2638_p12, %p2632_p4 }
  0x46   : > { %2642 = shalt.err (!%p2639_p13)
}
  0x47   : > { %s3571_s14 = smov 64   ;;  %s3572_s29 = smov 4  }
  0x48   : > { %2460 = dma.hbm_to_vmem [thread:$0]  (!%p3031_p6), %s3026_s10, 256, %s3035_s26, %s3037_s17, %s3571_s14, %s3571_s14, %s3572_s29  }
  0x49   : > { %p277_p0 = scmp.ne.s32.totalorder %s2793_s28, %s2789_s27  ;;  %s3623_s11 = sshll.u32 %s2821_s21, 8 }
  0x4a   : > { %s3624_s12 = sld [smem:[#allocation44_spill]]  ;;  %p2233_p4 = scmp.ge.s32.totalorder %s2829_s2, 1 }
  0x4b   : > { %s670_s16 = scalar_lea.vmem [#allocation12], %s3018_s15  ;;  %p717_p10 = scmp.lt.s32.totalorder %s2829_s2, 5 }
  0x4c   : > { %s677_s8 = sshll.u32 %s670_s16, 4  ;;  %s3085_s10 = sadd.s32 4294967295, %s2829_s2   ;;  %s3152_s8 = int_to_ptr.vmem [resolvable:$true] %s677_s8 }
  0x4d   : > { %p3080_p2 = pnand %p2233_p4, %p717_p10  ;;  %s2222_s26 = sadd.s32 4294967294, %s2829_s2  }
  0x4e   : > { %s56_s15 = sadd.s32 1, %s2809_s19  ;;  %p63_p3 = scmp.ne.s32.totalorder %s2809_s19, %s2805_s0 }
  0x4f   : > { %s3625_s9 = scalar_select %p3080_p2, 1, 0 }
  0x50   : > { %s3075_s23 = scalar_lea.hbm %s3624_s12, %s3623_s11  ;;  %s49_s11 = sadd.s32 1, %s2825_s22 }
  0x51   : > { %s3701_s11 = smov (!%p2997_p1, %s49_s11), %s2825_s22  ;;  %p69_p7 = scmp.ne.s32.totalorder %s2805_s0, %s2801_s30 }
  0x52   : > { %p51_p5 = scmp.ge.s32.totalorder %s3701_s11, 2  ;;  %p3626_p9 = scmp.eq.s32.totalorder %s2829_s2, 0 }
  0x53   : > { %p70_p12 = scmp.eq.s32.totalorder %s3085_s10, 0  ;;  %p535_p4 = scmp.eq.s32.totalorder %s3085_s10, 3 }
  0x54   : > { %p3099_p11 = por %p3626_p9, %p63_p3  ;;  %s3703_s11 = smov (%p51_p5, %s3701_s11), 0 }
  0x55   : > { %3628 = sst [smem:[#allocation28_spill]] %s3703_s11  ;;  %p3109_p1 = por %p70_p12, %p69_p7 }
  0x56   : > { %p3116_p13 = por %p277_p0, %p70_p12  ;;  %s53_s16 = ssub.s32 %s2825_s22, %s3703_s11 }
  0x57   : > { %s3629_s24 = scalar_select %p3109_p1, 1, 0 }
  0x58   : > { %s3630_s13 = scalar_select %p3116_p13, 1, 0 }
  0x59   : > { %p54_p10 = scmp.eq.s32.totalorder %s53_s16, 0  ;;  %p541_p9 = scmp.eq.s32.totalorder %s2222_s26, 3 }
  0x5a   : > { %p3123_p8 = por %p535_p4, %p63_p3  ;;  %s561_s29 = sand.u32 1, %s2809_s19  }
  0x5b   : > { %s3129_s21 = scalar_select %p54_p10, %s2809_s19, %s56_s15  }
  0x5c   : > { %s3631_s14 = scalar_select %p3123_p8, 1, 0 }
  0x5d   : > { %3633 = sst [smem:[#allocation30_spill]] %s3129_s21  ;;  %p3134_p5 = por %p541_p9, %p69_p7 }
  0x5e   : > { %3632 = sst [smem:[#allocation29_spill]] %s3631_s14  ;;  %s2225_s27 = sshll.u32 %s561_s29, 3 }
  0x5f   : > { %s3634_s7 = scalar_select %p3134_p5, 1, 0 }
  0x60   : > { %s2226_s6 = sshll.u32 %s2825_s22, 7  ;;  %s3636_s11 = sld [smem:[#allocation32_spill]] }
  0x61   : > { %3635 = sst [smem:[#allocation31_spill]] %s3634_s7  ;;  %s565_s26 = scalar_lea.vmem [#allocation7], %s2225_s27 }
  0x62   : > { %s572_s16 = sshll.u32 %s565_s26, 4  ;;  %p3637_p0 = scmp.lt.s32.totalorder %s2829_s2, 4  ;;  %s3154_s16 = int_to_ptr.vmem [resolvable:$true] %s572_s16 }
  0x63   : > { %s562_s4 = scalar_lea.sflag [#allocation8], %s561_s29 }
  0x64   : > { %p3148_p3 = pnand %p3637_p0, %p3099_p11 }
  0x66   : > { %s3142_s3 = scalar_lea.hbm %s3636_s11, %s2226_s6  ;;  %p2645_p12 = pneg %p3148_p3 }
  0x67   : > { %s2643_s5 = scalar_lea.hbm %s3142_s3, 128  ;;  %s2648_s27 = scalar_lea.hbm %s3636_s11, 256 }
  0x68   : > { %p2644_p7 = scmp.ne.s32.totalorder %s3142_s3, %s2643_s5  ;;  %p2649_p11 = scmp.lt.u32.totalorder %s3142_s3, %s3636_s11 }
  0x69   : > { %p2650_p9 = scmp.lt.u32.totalorder %s2648_s27, %s2643_s5  ;;  %p2652_p5 = scmp.lt.u32.totalorder %s2643_s5, %s3142_s3 }
  0x6a   : > { %p2646_p4 = pnand %p2645_p12, %p2644_p7 }
  0x6b   : > { %p2651_p0 = por %p2650_p9, %p2649_p11 }
  0x6c   : > { %p2647_p10 = pneg %p2646_p4 }
  0x6d   : > { %p2653_p8 = por %p2652_p5, %p2651_p0 }
  0x6f   : > { %p2654_p13 = pnand %p2653_p8, %p2647_p10 }
  0x71   : > { %2657 = shalt.err (!%p2654_p13)
}
  0x72   : > { %s2658_s29 = scalar_lea.vmem %s3154_s16, 128  ;;  %s2834_s6 = smov [#allocation7]  }
  0x73   : > { %p2659_p7 = scmp.ne.s32.totalorder %s3154_s16, %s2658_s29  ;;  %s2663_s18 = sshll.u32 %s2834_s6, 4  ;;  %s2664_s18 = int_to_ptr.vmem [resolvable:$false] %s2663_s18 }
  0x74   : > { %s2665_s22 = scalar_lea.vmem %s2664_s18, 256  ;;  %p2666_p2 = scmp.lt.s32.totalorder %s3154_s16, %s2664_s18 }
  0x75   : > { %p2661_p4 = pnand %p2659_p7, %p2645_p12  ;;  %p2667_p11 = scmp.lt.s32.totalorder %s2665_s22, %s2658_s29 }
  0x77   : > { %p2662_p1 = pneg %p2661_p4  ;;  %p2668_p9 = por %p2667_p11, %p2666_p2 }
  0x79   : > { %p2669_p5 = pnand %p2668_p9, %p2662_p1 }
  0x7b   : > { %2672 = shalt.err (!%p2669_p5)
}
  0x7c   : > { %2457 = dma.hbm_to_vmem [thread:$0]  (!%p3148_p3), %s3142_s3, 128, %s3154_s16, %s562_s4  }
  0x7d   : > { %s2673_s5 = scalar_lea.hbm %s3075_s23, 256  ;;  %p3639_p13 = pneg %p3031_p6 }
  0x7e   : > { %p2674_p8 = scmp.ne.s32.totalorder %s3075_s23, %s2673_s5  ;;  %s2678_s29 = scalar_lea.hbm %s3624_s12, 512 }
  0x7f   : > { %p2679_p2 = scmp.lt.u32.totalorder %s3075_s23, %s3624_s12  ;;  %p2680_p1 = scmp.lt.u32.totalorder %s2678_s29, %s2673_s5 }
  0x80   : > { %p2676_p12 = pnand %p2674_p8, %p3639_p13  ;;  %p2682_p7 = scmp.lt.u32.totalorder %s2673_s5, %s3075_s23 }
  0x81   : > { %p2681_p0 = por %p2680_p1, %p2679_p2 }
  0x82   : > { %p2677_p10 = pneg %p2676_p12 }
  0x83   : > { %p2683_p4 = por %p2682_p7, %p2681_p0 }
  0x85   : > { %p2684_p11 = pnand %p2683_p4, %p2677_p10 }
  0x87   : > { %2687 = shalt.err (!%p2684_p11)
}
  0x88   : > { %s2688_s3 = scalar_lea.vmem %s3152_s8, 256  ;;  %p3640_p9 = pmov %p3639_p13 }
  0x89   : > { %p2689_p3 = scmp.ne.s32.totalorder %s3152_s8, %s2688_s3  ;;  %s2835_s16 = smov [#allocation12]  }
  0x8a   : > { %s2693_s4 = sshll.u32 %s2835_s16, 4  ;;  %s2694_s4 = int_to_ptr.vmem [resolvable:$false] %s2693_s4 }
  0x8b   : > { %p2691_p5 = pnand %p2689_p3, %p3640_p9  ;;  %s2695_s18 = scalar_lea.vmem %s2694_s4, 512 }
  0x8c   : > { %p2696_p13 = scmp.lt.s32.totalorder %s3152_s8, %s2694_s4  ;;  %p2697_p12 = scmp.lt.s32.totalorder %s2695_s18, %s2688_s3 }
  0x8d   : > { %p2692_p8 = pneg %p2691_p5 }
  0x8e   : > { %p2698_p2 = por %p2697_p12, %p2696_p13 }
  0x90   : > { %p2699_p1 = pnand %p2698_p2, %p2692_p8 }
  0x92   : > { %2702 = shalt.err (!%p2699_p1)
}
  0x93   : > { %s3641_s22 = smov 4   ;;  %s3642_s5 = smov 64  }
  0x94   : > { %2463 = dma.hbm_to_vmem [thread:$0]  (!%p3031_p6), %s3075_s23, 256, %s3152_s8, %s3037_s17, %s3642_s5, %s3642_s5, %s3641_s22  }
  0x95   : > { %p3643_p10 = scmp.ne.s32.totalorder %s3625_s9, 0 }
  0x96   : > { %s3211_s27 = sand.u32 (!%p3643_p10), 1, %s2805_s0   ;;  %p3644_p0 = scmp.ne.s32.totalorder (!%p3643_p10), %s3629_s24, 0 }
  0x97   : > { %721 = sbr.rel (%p3643_p10) target bundleno = 2756 (0xac4), region = 92  ;;  %s2234_s26 = sshll.u32 (!%p3643_p10), %s3211_s27, 3 }
  0x98   : > { %s724_s29 = scalar_lea.sflag (!%p3643_p10), [#allocation8], %s3211_s27  ;;  %s3215_s6 = scalar_lea.vmem (!%p3643_p10), [#allocation7], %s2234_s26 }
  0x9e   : > { %2776 = dma.done.wait (%p3644_p0), %s724_s29, 128  }
  0x9f   : > { %2778 = vsyncadd (%p3644_p0), %s724_s29, 4294967168  ;;  %s732_s8 = sand.u32 1, %s3085_s10   ;;  %s734_s9 = sand.u32 1, %s2793_s28  }
  0xa0   : > { %s3223_s25 = sshll.u32 %s734_s9, 4  ;;  %s733_s17 = scalar_lea.sflag [#allocation11], %s732_s8 }
  0xa1   : > { %p3645_p6 = scmp.ne.s32.totalorder %s3630_s13, 0 }
  0xa3   : > { %2780 = dma.done.wait (%p3645_p6), %s733_s17, 512  }
  0xa4   : > { %2782 = vsyncadd (%p3645_p6), %s733_s17, 4294966784  ;;  %p860_p7 = scmp.lt.s32.totalorder %s2817_s20, 1  ;;  %p863_p4 = scmp.lt.s32.totalorder %s2813_s1, 1 }
  0xa5   : > { %s3648_s9 = sld [smem:[#allocation34_spill]]  ;;  %s3649_s23 = sld [smem:[#allocation36_spill]] }
  0xa6   : > { %s3233_s24 = scalar_select %p860_p7, %s2817_s20, 1 }
  0xa7   : > { %s3236_s10 = scalar_select %p863_p4, %s2813_s1, 1 }
  0xa8   : > { %s3651_s28 = sld [smem:[#allocation38_spill]]  ;;  %s3652_s26 = sld [smem:[#allocation39_spill]] }
  0xa9   : > { %s2303_s4 = sshll.u32 %s3236_s10, 4  ;;  %s3660_s21 = sld [smem:[#allocation49_spill]] }
  0xaa   : > { %s745_s13 = scalar_lea.vmem [#allocation12], %s3223_s25  ;;  %s859_s0 = scalar_lea.vmem [#allocation13], %s3211_s27 }
  0xab   : > { %s3250_s17 = scalar_lea.vmem %s3648_s9, %s2303_s4  ;;  %s875_s11 = scalar_lea.vmem %s3649_s23, %s2303_s4 }
  0xac   : > { %s3658_s9 = sld [smem:[#allocation47_spill]]  ;;  %s3659_s23 = sld [smem:[#allocation48_spill]] }
  0xad   : > { %p2245_p11 = scmp.ne.s32.totalorder %s2813_s1, 0 }
  0xae   : > { %s3262_s18 = scalar_lea.vmem %s3651_s28, %s2303_s4  ;;  %s886_s29 = scalar_lea.vmem %s3652_s26, %s3236_s10  ;;  %v918_v0 = vld [vmem:[%s3215_s6] sm:$0xff] (!%p2245_p11)  ;;  %vm919_vm0 = vcmask (!%p2245_p11), 261120  }
  0xaf   : > { %s3656_s28 = sld [smem:[#allocation45_spill]]  ;;  %s2306_s4 = sshll.u32 %s3236_s10, 5  ;;  %920 = vst.msk [vmem:[#allocation2] sm:$0xff] (!%p2245_p11), %vm919_vm0, %v918_v0 }
  0xb0   : > { %s3657_s26 = sld [smem:[#allocation46_spill]]  ;;  %s912_s16 = scalar_lea.vmem %s3660_s21, %s3236_s10 }
  0xb1   : > { %917 = sbr.rel (%p2245_p11) target bundleno = 184 (0xb8), region = 108 }
  0xb2   : > { %s906_s30 = scalar_lea.vmem %s3658_s9, %s3236_s10  ;;  %s909_s3 = scalar_lea.vmem %s3659_s23, %s3236_s10 }
  0xb5   : > { %s898_s19 = scalar_lea.vmem %s3656_s28, %s3236_s10 }
  0xb6   : > { %s3288_s5 = scalar_lea.vmem %s3657_s26, %s2306_s4 }
  0xb8 PF: > { %v2568_v1 = vld [vmem:[%s875_s11] sm:$0xff]   ;;  %v2836_v2 = vmov 0.0   ;;  %v2570_v4 = vld [vmem:[%s875_s11 + $0x8] sm:$0xff]   ;;  %vm2837_vm1 = vmmov 0   ;;  %vm946_vm2 = vcmask 261120   ;;  %s3661_s6 = sld [smem:[#allocation37_spill]] }
  0xb9   : > { %2354 = vmatprep.subr.bf16.mxu1 %v2836_v2  ;;  %2346 = vmatprep.subr.bf16.mxu0 %v2836_v2  ;;  %v2569_v3 = vld [vmem:[%s3250_s17] sm:$0xff]   ;;  %v2571_v6 = vld [vmem:[%s3250_s17 + $0x8] sm:$0xff]   ;;  %s3663_s22 = sld [smem:[#allocation35_spill]]  ;;  %vm991_vm3 = vcmask 257024   ;;  %vm1143_vm4 = vcmask 64512   ;;  %s2838_s8 = smov 112  }
  0xba   : > { %2355 = vmatpush3.bf16.msra.mxu1 %v2568_v1  ;;  %2358 = vmatprep.mubr.msk.bf16.mxu1 %vm2837_vm1, %v2836_v2  ;;  %v3312_v5 = vld [vmem:[#allocation2] sm:$0xff]  ;;  %s2839_s7 = smov 120   ;;  %s2840_s9 = smov 104   ;;  %v2579_v32 = vld [vmem:[%s3262_s18 + $0x8] sm:$0xff]   ;;  %vm1205_vm5 = vcmask 1043456   ;;  %vm1250_vm6 = vcmask 60416  }
  0xbb   : > { %2356 = vmatprep.subr.bf16.mxu1 %v2836_v2  ;;  %2347 = vmatpush3.bf16.msra.mxu0 %v2569_v3  ;;  %v994_v7 = vpack.c.bf16 %v3312_v5, %v3312_v5  ;;  %v2578_v31 = vld [vmem:[%s3262_s18] sm:$0xff]   ;;  %s3665_s15 = sld [smem:[#allocation33_spill]]  ;;  %s2842_s11 = smov 16   ;;  %vm1381_vm7 = vcmask 126016   ;;  %vm1512_vm8 = vcmask 191616   ;;  %vm1643_vm9 = vcmask 257216  }
  0xbc   : > { %2348 = vmatprep.subr.bf16.mxu0 %v2836_v2  ;;  %2350 = vmatprep.mubr.msk.bf16.mxu0 %vm2837_vm1, %v2836_v2  ;;  %v2254_v49 = vld [vmem:[%s886_s29] ss:$0 sm:$0xff]  ;;  %s3668_s29 = scalar_lea.vmem [#allocation10], %s3223_s25  ;;  %s3670_s4 = sld [smem:[#allocation41_spill]]  ;;  %vm1860_vm10 = vcmask 523264  }
  0xbd   : > { %s3669_s20 = smov %s3668_s29  ;;  %p2297_p3 = scmp.ne.s32.totalorder %s2813_s1, 1 }
  0xbe   : > { %2357 = vmatpush3.bf16.msra.mxu1 %v2570_v4  ;;  %s3662_s17 = scalar_lea.vmem %s3661_s6, %s3236_s10  ;;  %s2843_s6 = smov 24   ;;  %vm1939_vm11 = vcmask (!%p2297_p3), 253952  }
  0xbf   : > { %2349 = vmatpush3.bf16.msra.mxu0 %v2571_v6  ;;  %2370 = vmatprep.subr.bf16.mxu1 %v2836_v2  ;;  %v2250_v8 = vld [vmem:[%s3662_s17] ss:$0 sm:$0xff]  ;;  %s3664_s26 = scalar_lea.vmem %s3663_s22, %s3236_s10 }
  0xc0   : > { %2362 = vmatprep.subr.bf16.mxu0 %v2836_v2  ;;  %v2246_v9 = vld [vmem:[%s3664_s26] ss:$0 sm:$0xff] }
  0xc1   : > { %2359 = vmatmul.mubr.msk.bf16.vlgmr.msra.gmra.mrb[0].mxu1 %vm946_vm2, %v994_v7  ;;  %s3666_s23 = scalar_lea.vmem %s3665_s15, %s3233_s24  ;;  %s2841_s24 = smov 8  }
  0xc2   : > { %2351 = vmatmul.mubr.msk.bf16.vlgmr.msra.gmra.mrb[0].mxu0 %vm946_vm2, %v994_v7  ;;  %2372 = vmatprep.mubr.msk.bf16.mxu1 %vm2837_vm1, %v2836_v2  ;;  %v2258_v42 = vld [vmem:[%s3666_s23] ss:$0 sm:$0xff]  ;;  %s3671_s22 = scalar_lea.vmem %s3670_s4, %s3236_s10 }
  0xc3   : > { %2366 = vmatprep.mubr.msk.bf16.mxu0 %vm2837_vm1, %v2836_v2  ;;  %2363 = vmatpush3.bf16.msra.mxu0 %v2578_v31 }
  0xc4   : > { %2364 = vmatprep.subr.bf16.mxu0 %v2836_v2 }
  0xc7   : > { %2365 = vmatpush3.bf16.msra.mxu0 %v2579_v32 }
  0xc8   : > { %2376 = vmatprep.subr.bf16.mxu0 %v2836_v2 }
  0xca   : > { %2367 = vmatmul.mubr.msk.bf16.vlgmr.msra.gmra.mrb[4].mxu0 %vm946_vm2, %v994_v7 }
  0xcb   : > { %2378 = vmatprep.mubr.msk.bf16.mxu0 %vm2837_vm1, %v2836_v2 }
 0x194   : > { %v1055_v10 = vpop.f32.mrb[0].mxu1 }
 0x195   : > { %v1056_v11 = vadd.f32 %v2250_v8, %v1055_v10  ;;  %v2360_v12 = vpop.f32.mrb[1].mxu1  ;;  %v984_v13 = vpop.f32.mrb[0].mxu0 }
 0x196   : > { %v1058_v14 = vpop.f32.mrb[2].mxu1  ;;  %v985_v15 = vadd.f32 %v2246_v9, %v984_v13  ;;  %v2352_v16 = vpop.f32.mrb[1].mxu0 }
 0x197   : > { %v1061_v17 = vpack.c.bf16 %v1056_v11, %v1056_v11  ;;  %v2361_v18 = vpop.f32.mrb[3].mxu1  ;;  %v987_v19 = vpop.f32.mrb[2].mxu0 }
 0x198   : > { %v990_v20 = vpack.c.bf16 %v985_v15, %v985_v15  ;;  %v2353_v21 = vpop.f32.mrb[3].mxu0 }
 0x199   : > { %1062 = vst.msk [vmem:[#allocation4] sm:$0xf] %vm991_vm3, %v1061_v17 }
 0x19a   : > { %992 = vst.msk [vmem:[#allocation3] sm:$0xf] %vm991_vm3, %v990_v20 }
 0x19d   : > { %v1125_v50 = vpop.f32.mrb[4].mxu0 }
 0x19e   : > { %v1126_v51 = vadd.f32 %v2254_v49, %v1125_v50  ;;  %v2368_v52 = vpop.f32.mrb[5].mxu0 }
 0x19f   : > { %v1128_v53 = vpop.f32.mrb[6].mxu0 }
 0x1a0   : > { %v1135_v22 = vld [vmem:[#allocation4] sm:$0xf]  ;;  %v1131_v54 = vpack.c.bf16 %v1126_v51, %v1126_v51  ;;  %v2369_v55 = vpop.f32.mrb[7].mxu0 }
 0x1a1   : > { %v2572_v23 = vld [vmem:[#allocation4] ss:$0 sps:$4 sm:$0xff]   ;;  %v1148_v24 = vsel %vm1143_vm4, %v1135_v22, 0  ;;  %v2574_v26 = vld [vmem:[#allocation3] ss:$0 sps:$4 sm:$0xff]  }
 0x1a2   : > { %v2573_v25 = vld [vmem:[#allocation4] ss:$0 sps:$4 sm:$0xff]   ;;  %2371 = vmatpush3.bf16.xpose.msra.mxu1 %v1148_v24  ;;  %1394 = vrot.lane.b32.xlu1 %v2572_v23, %s2838_s8  ;;  %v2575_v27 = vld [vmem:[#allocation3] ss:$0 sps:$4 sm:$0xff]   ;;  %1132 = vst.msk [vmem:[#allocation5] sm:$0xf] %vm991_vm3, %v1131_v54 }
 0x1a3   : > { %1263 = vrot.lane.b32.xlu0 %v2573_v25, %s2839_s7  ;;  %2382 = vmatprep.subr.bf16.mxu1 %v2836_v2  ;;  %v1134_v28 = vld [vmem:[#allocation3] sm:$0xf]  ;;  %v2577_v30 = vld [vmem:[#allocation4] ss:$0 sps:$4 sm:$0xff]  }
 0x1a4   : > { %v2576_v29 = vld [vmem:[#allocation3] ss:$0 sps:$4 sm:$0xff]  }
 0x1a6   : > { %1389 = vrot.lane.b32.xlu1 %v2574_v26, %s2838_s8 }
 0x1a7   : > { %1258 = vrot.lane.b32.xlu0 %v2575_v27, %s2839_s7 }
 0x1a9   : > { %2373 = vmatmul.mubr.msk.bf16.vlgmr.msra.gmra.mrb[4].mxu1 %vm1143_vm4, %v1134_v28  ;;  %v1136_v56 = vld [vmem:[#allocation5] sm:$0xf] }
 0x1aa   : > { %1520 = vrot.lane.b32.xlu1 %v2576_v29, %s2840_s9  ;;  %2384 = vmatprep.mubr.msk.bf16.mxu1 %vm2837_vm1, %v2836_v2  ;;  %v1207_v57 = vsel %vm1205_vm5, %v1136_v56, 0  ;;  %v2580_v19 = vld [vmem:[#allocation5] ss:$0 sps:$4 sm:$0xff]  }
 0x1ab   : > { %1525 = vrot.lane.b32.xlu0 %v2577_v30, %s2840_s9  ;;  %2377 = vmatpush3.bf16.msra.mxu0 %v1207_v57 }
 0x1ac   : > { %2388 = vmatprep.subr.bf16.mxu0 %v2836_v2 }
 0x214   : > { %v1395_v35 = vpop.permute.xlu1 %1394 }
 0x215   : > { %v1264_v33 = vpop.permute.xlu0 %1263  ;;  %v1400_v37 = vsel %vm1143_vm4, %v1395_v35, 0  ;;  %v2581_v35 = vld [vmem:[#allocation5] ss:$0 sps:$4 sm:$0xff]  }
 0x216   : > { %v1269_v34 = vsel %vm1143_vm4, %v1264_v33, 0 }
 0x217   : > { %2383 = vmatpush3.bf16.xpose.msra.mxu1 %v1269_v34 }
 0x218   : > { %2394 = vmatprep.subr.bf16.mxu1 %v2836_v2  ;;  %v1390_v39 = vpop.permute.xlu1 %1389 }
 0x219   : > { %v1259_v36 = vpop.permute.xlu0 %1258 }
 0x21c   : > { %v1521_v41 = vpop.permute.xlu1 %1520 }
 0x21d   : > { %v1526_v38 = vpop.permute.xlu0 %1525 }
 0x21e   : > { %2385 = vmatmul.mubr.msk.bf16.vlgmr.msra.gmra.mrb[8].mxu1 %vm1143_vm4, %v1259_v36  ;;  %v1531_v40 = vsel %vm1143_vm4, %v1526_v38, 0 }
 0x21f   : > { %2395 = vmatpush3.bf16.xpose.msra.mxu1 %v1400_v37  ;;  %2396 = vmatprep.mubr.msk.bf16.mxu1 %vm2837_vm1, %v2836_v2 }
 0x220   : > { %2406 = vmatprep.subr.bf16.mxu1 %v2836_v2 }
 0x226   : > { %2397 = vmatmul.mubr.msk.bf16.vlgmr.msra.gmra.mrb[12].mxu1 %vm1143_vm4, %v1390_v39 }
 0x227   : > { %2407 = vmatpush3.bf16.xpose.msra.mxu1 %v1531_v40  ;;  %2408 = vmatprep.mubr.msk.bf16.mxu1 %vm2837_vm1, %v2836_v2  ;;  %v2582_v40 = vld [vmem:[#allocation5] ss:$0 sps:$4 sm:$0xff]  }
 0x228   : > { %2418 = vmatprep.subr.bf16.mxu1 %v2836_v2 }
 0x22e   : > { %2409 = vmatmul.mubr.msk.bf16.vlgmr.msra.gmra.mrb[16].mxu1 %vm1143_vm4, %v1521_v41 }
 0x22f   : > { %2422 = vmatprep.mubr.msk.bf16.mxu1 %vm2837_vm1, %v2836_v2 }
 0x27c   : > { %v1184_v43 = vpop.f32.mrb[4].mxu1 }
 0x27d   : > { %v1185_v44 = vadd.f32 %v2258_v42, %v1184_v43  ;;  %v2374_v45 = vpop.f32.mrb[5].mxu1 }
 0x27e   : > { %v1187_v46 = vpop.f32.mrb[6].mxu1 }
 0x27f   : > { %v2375_v47 = vpop.f32.mrb[7].mxu1  ;;  %v1190_v48 = vsel %vm1143_vm4, %v1185_v44, -inf }
 0x280   : > { %1191 = vmax.xlane.f32.xlu0 %v1190_v48 }
 0x2f1   : > { %v1305_v58 = vpop.f32.mrb[8].mxu1 }
 0x2f2   : > { %v1306_v59 = vadd.f32 %v2258_v42, %v1305_v58  ;;  %v2386_v60 = vpop.f32.mrb[9].mxu1 }
 0x2f3   : > { %v1308_v61 = vpop.f32.mrb[10].mxu1 }
 0x2f4   : > { %v2387_v62 = vpop.f32.mrb[11].mxu1  ;;  %v1311_v63 = vsel %vm1143_vm4, %v1306_v59, -inf }
 0x2f5   : > { %1312 = vmax.xlane.f32.xlu1 %v1311_v63 }
 0x2f9   : > { %v1436_v0 = vpop.f32.mrb[12].mxu1 }
 0x2fa   : > { %v1437_v1 = vadd.f32 %v2258_v42, %v1436_v0  ;;  %v2398_v3 = vpop.f32.mrb[13].mxu1 }
 0x2fb   : > { %v1439_v4 = vpop.f32.mrb[14].mxu1 }
 0x2fc   : > { %v2399_v6 = vpop.f32.mrb[15].mxu1  ;;  %v1442_v7 = vsel %vm1143_vm4, %v1437_v1, -inf }
 0x2fd   : > { %1443 = vmax.xlane.f32.xlu0 %v1442_v7  ;;  %v2583_v7 = vld [vmem:[%s3668_s29] sm:$0xff]  }
 0x2fe   : > { %2419 = vmatpush3.bf16.msra.mxu1 %v2583_v7 }
 0x2ff   : > { %2420 = vmatprep.subr.bf16.mxu1 %v2836_v2 }
 0x301   : > { %v1567_v8 = vpop.f32.mrb[16].mxu1 }
 0x302   : > { %v1568_v9 = vadd.f32 %v2258_v42, %v1567_v8  ;;  %v2410_v10 = vpop.f32.mrb[17].mxu1 }
 0x303   : > { %v1570_v11 = vpop.f32.mrb[18].mxu1 }
 0x304   : > { %v2411_v12 = vpop.f32.mrb[19].mxu1  ;;  %v1573_v13 = vsel %vm1143_vm4, %v1568_v9, -inf }
 0x305   : > { %1574 = vmax.xlane.f32.xlu0 %v1573_v13 }
 0x30d   : > { %v1192_v14 = vpop.xlane.xlu0 %1191 }
 0x30e   : > { %v1193_v15 = vsub.f32 %v1185_v44, %v1192_v14 }
 0x310   : > { %v1194_v16 = vmul.f32 1.442695, %v1193_v15 }
 0x312   : > { %2591 = vpow2.f32 %v1194_v16 }
 0x31c   : > { %v2592_v17 = vpop.eup %2591 }
 0x31d   : > { %v1196_v18 = vsel %vm1143_vm4, %v2592_v17, 0.0 }
 0x31e   : > { %1197 = vadd.xlane.f32.xlu1 %v1196_v18 }
 0x32f   : > { %1326 = vrot.lane.b32.xlu1 %v2580_v19, %s2839_s7  ;;  %s3672_s7 = sld [smem:[#allocation42_spill]] }
 0x382   : > { %v1313_v20 = vpop.xlane.xlu1 %1312 }
 0x383   : > { %v1314_v21 = vsub.f32 %v1306_v59, %v1313_v20 }
 0x385   : > { %v1315_v22 = vmul.f32 1.442695, %v1314_v21 }
 0x387   : > { %2593 = vpow2.f32 %v1315_v22 }
 0x38a   : > { %v1444_v23 = vpop.xlane.xlu0 %1443 }
 0x38b   : > { %v1445_v24 = vsub.f32 %v1437_v1, %v1444_v23  ;;  %v2279_v23 = vld [vmem:[%s3671_s22] ss:$0 sm:$0xff] }
 0x38d   : > { %v1446_v25 = vmul.f32 1.442695, %v1445_v24 }
 0x38f   : > { %2595 = vpow2.f32 %v1446_v25 }
 0x391   : > { %v2594_v26 = vpop.eup %2593 }
 0x392   : > { %v1575_v27 = vpop.xlane.xlu0 %1574  ;;  %v1317_v28 = vsel %vm1143_vm4, %v2594_v26, 0.0 }
 0x393   : > { %v1576_v29 = vsub.f32 %v1568_v9, %v1575_v27  ;;  %1318 = vadd.xlane.f32.xlu0 %v1317_v28  ;;  %v2584_v9 = vld [vmem:[%s3669_s20 + $0x8] sm:$0xff]  }
 0x394   : > { %2421 = vmatpush3.bf16.msra.mxu1 %v2584_v9 }
 0x395   : > { %v1577_v30 = vmul.f32 1.442695, %v1576_v29  ;;  %2434 = vmatprep.subr.bf16.mxu1 %v2836_v2 }
 0x397   : > { %2597 = vpow2.f32 %v1577_v30 }
 0x399   : > { %v2596_v31 = vpop.eup %2595 }
 0x39a   : > { %v1448_v32 = vsel %vm1143_vm4, %v2596_v31, 0.0 }
 0x39b   : > { %1449 = vadd.xlane.f32.xlu1 %v1448_v32 }
 0x3a1   : > { %v2598_v33 = vpop.eup %2597 }
 0x3a2   : > { %v1579_v34 = vsel %vm1143_vm4, %v2598_v33, 0.0 }
 0x3a3   : > { %1580 = vadd.xlane.f32.xlu0 %v1579_v34 }
 0x3ab   : > { %v1198_v36 = vpop.xlane.xlu1 %1197 }
 0x3ac   : > { %2599 = vrcp.f32 %v1198_v36  ;;  %1588 = vrot.lane.b32.xlu1 %v2581_v35, %s2840_s9  ;;  %v2585_v36 = vld [vmem:[%s745_s13] sm:$0xff]   ;;  %s3673_s9 = scalar_lea.vmem %s3672_s7, %s3236_s10 }
 0x3af   : > { %v1327_v38 = vpop.permute.xlu1 %1326 }
 0x3b0   : > { %v1332_v42 = vsel %vm1205_vm5, %v1327_v38, 0 }
 0x3b6   : > { %v2600_v37 = vpop.eup %2599 }
 0x3b7   : > { %v1200_v39 = vmul.f32 %v2600_v37, %v2592_v17  ;;  %v2586_v37 = vld [vmem:[%s745_s13 + $0x8] sm:$0xff]   ;;  %s3674_s13 = sld [smem:[#allocation43_spill]] }
 0x3b9   : > { %1457 = vrot.lane.b32.xlu0 %v2582_v40, %s2838_s8  ;;  %v1201_v41 = vpack.c.bf16 %v1200_v39, %v1200_v39 }
 0x3bb   : > { %2379 = vmatmul.mubr.msk.bf16.vlgmr.msra.gmra.mrb[8].mxu0 %vm1143_vm4, %v1201_v41  ;;  %v2283_v41 = vld [vmem:[%s3673_s9] ss:$0 sm:$0xff] }
 0x3bc   : > { %2389 = vmatpush3.bf16.msra.mxu0 %v1332_v42  ;;  %2390 = vmatprep.mubr.msk.bf16.mxu0 %vm2837_vm1, %v2836_v2 }
 0x3bd   : > { %2400 = vmatprep.subr.bf16.mxu0 %v2836_v2  ;;  %s3675_s2 = scalar_lea.vmem %s3674_s13, %s3236_s10 }
 0x420   : > { %v1319_v43 = vpop.xlane.xlu0 %1318 }
 0x421   : > { %2601 = vrcp.f32 %v1319_v43  ;;  %v2284_v43 = vld [vmem:[%s3675_s2] ss:$0 sm:$0xff] }
 0x428   : > { %v1450_v44 = vpop.xlane.xlu1 %1449 }
 0x429   : > { %2603 = vrcp.f32 %v1450_v44 }
 0x42b   : > { %v2602_v45 = vpop.eup %2601 }
 0x42c   : > { %v1321_v46 = vmul.f32 %v2602_v45, %v2594_v26  ;;  %v1589_v53 = vpop.permute.xlu1 %1588 }
 0x42d   : > { %v1594_v55 = vsel %vm1205_vm5, %v1589_v53, 0 }
 0x42e   : > { %v1322_v47 = vpack.c.bf16 %v1321_v46, %v1321_v46 }
 0x430   : > { %v1581_v48 = vpop.xlane.xlu0 %1580  ;;  %2391 = vmatmul.mubr.msk.bf16.vlgmr.msra.gmra.mrb[12].mxu0 %vm1143_vm4, %v1322_v47  ;;  %v2587_v47 = vld [vmem:[%s3288_s5] sm:$0xff]  }
 0x431   : > { %2605 = vrcp.f32 %v1581_v48  ;;  %2402 = vmatprep.mubr.msk.bf16.mxu0 %vm2837_vm1, %v2836_v2  ;;  %v2588_v48 = vld [vmem:[%s3288_s5 + $0x8] sm:$0xff]  }
 0x433   : > { %v2604_v49 = vpop.eup %2603 }
 0x434   : > { %v1452_v50 = vmul.f32 %v2604_v49, %v2596_v31  ;;  %v1458_v51 = vpop.permute.xlu0 %1457  ;;  %v2589_v49 = vld [vmem:[%s3288_s5 + $0x10] sm:$0xff]  }
 0x435   : > { %v1463_v52 = vsel %vm1205_vm5, %v1458_v51, 0  ;;  %v2285_v51 = vld [vmem:[%s898_s19] ss:$0 sm:$0xff] }
 0x436   : > { %2401 = vmatpush3.bf16.msra.mxu0 %v1463_v52  ;;  %v1453_v54 = vpack.c.bf16 %v1452_v50, %v1452_v50  ;;  %v2590_v50 = vld [vmem:[%s3288_s5 + $0x18] sm:$0xff]  }
 0x437   : > { %2412 = vmatprep.subr.bf16.mxu0 %v2836_v2 }
 0x439   : > { %2403 = vmatmul.mubr.msk.bf16.vlgmr.msra.gmra.mrb[16].mxu0 %vm1143_vm4, %v1453_v54 }
 0x43a   : > { %2413 = vmatpush3.bf16.msra.mxu0 %v1594_v55  ;;  %2414 = vmatprep.mubr.msk.bf16.mxu0 %vm2837_vm1, %v2836_v2 }
 0x43b   : > { %v2606_v56 = vpop.eup %2605  ;;  %2426 = vmatprep.subr.bf16.mxu0 %v2836_v2 }
 0x43c   : > { %v1583_v57 = vmul.f32 %v2606_v56, %v2598_v33 }
 0x43e   : > { %v1584_v58 = vpack.c.bf16 %v1583_v57, %v1583_v57 }
 0x441   : > { %2415 = vmatmul.mubr.msk.bf16.vlgmr.msra.gmra.mrb[20].mxu0 %vm1143_vm4, %v1584_v58 }
 0x442   : > { %2430 = vmatprep.mubr.msk.bf16.mxu0 %vm2837_vm1, %v2836_v2  ;;  %2427 = vmatpush3.bf16.msra.mxu0 %v2585_v36 }
 0x443   : > { %2428 = vmatprep.subr.bf16.mxu0 %v2836_v2 }
 0x446   : > { %2429 = vmatpush3.bf16.msra.mxu0 %v2586_v37 }
 0x48e   : > { %v1243_v59 = vpop.f32.mrb[8].mxu0 }
 0x48f   : > { %v1249_v60 = vpack.c.bf16 %v1243_v59, %v1243_v59  ;;  %v2380_v61 = vpop.f32.mrb[9].mxu0 }
 0x490   : > { %v1246_v62 = vpop.f32.mrb[10].mxu0 }
 0x491   : > { %1251 = vst.msk [vmem:[#allocation6] sm:$0xf] %vm1250_vm6, %v1249_v60  ;;  %v2381_v63 = vpop.f32.mrb[11].mxu0 }
 0x503   : > { %v1368_v0 = vpop.f32.mrb[12].mxu0 }
 0x504   : > { %v2307_v1 = vpack.c.bf16 %v1368_v0, %v1368_v0  ;;  %v2392_v3 = vpop.f32.mrb[13].mxu0 }
 0x505   : > { %v1371_v4 = vpop.f32.mrb[14].mxu0  ;;  %v2289_v3 = vld [vmem:[%s906_s30] ss:$0 sm:$0xff] }
 0x506   : > { %1378 = vrot.lane.b32.xlu1 %v2307_v1, %s2841_s24  ;;  %v2393_v6 = vpop.f32.mrb[15].mxu0 }
 0x50c   : > { %v1499_v8 = vpop.f32.mrb[16].mxu0 }
 0x50d   : > { %v2308_v10 = vpack.c.bf16 %v1499_v8, %v1499_v8  ;;  %v2404_v11 = vpop.f32.mrb[17].mxu0 }
 0x50e   : > { %v1502_v12 = vpop.f32.mrb[18].mxu0 }
 0x50f   : > { %1509 = vrot.lane.b32.xlu0 %v2308_v10, %s2842_s11  ;;  %v2405_v13 = vpop.f32.mrb[19].mxu0 }
 0x514   : > { %v1630_v14 = vpop.f32.mrb[20].mxu0 }
 0x515   : > { %v2309_v15 = vpack.c.bf16 %v1630_v14, %v1630_v14  ;;  %v2416_v16 = vpop.f32.mrb[21].mxu0 }
 0x516   : > { %v1633_v17 = vpop.f32.mrb[22].mxu0 }
 0x517   : > { %1640 = vrot.lane.b32.xlu1 %v2309_v15, %s2843_s6  ;;  %v2417_v18 = vpop.f32.mrb[23].mxu0 }
 0x578   : > { %v1379_v19 = vpop.permute.xlu1 %1378 }
 0x579   : > { %1382 = vst.msk [vmem:[#allocation6] sm:$0xf] %vm1381_vm7, %v1379_v19 }
 0x581   : > { %v1510_v20 = vpop.permute.xlu0 %1509 }
 0x582   : > { %1513 = vst.msk [vmem:[#allocation6] sm:$0xf] %vm1512_vm8, %v1510_v20 }
 0x589   : > { %v1641_v21 = vpop.permute.xlu1 %1640 }
 0x58a   : > { %1644 = vst.msk [vmem:[#allocation6] sm:$0xf] %vm1643_vm9, %v1641_v21  ;;  %v2295_v21 = vld [vmem:[%s909_s3] ss:$0 sm:$0xff] }
 0x591   : > { %v1645_v22 = vld [vmem:[#allocation6] sm:$0xf] }
 0x592   : > { %2423 = vmatmul.mubr.msk.bf16.vlgmr.msra.gmra.mrb[20].mxu1 %vm946_vm2, %v1645_v22 }
 0x593   : > { %2442 = vmatprep.mubr.msk.bf16.mxu1 %vm2837_vm1, %v2836_v2  ;;  %2435 = vmatpush3.bf16.msra.mxu1 %v2587_v47 }
 0x594   : > { %2436 = vmatprep.subr.bf16.mxu1 %v2836_v2 }
 0x597   : > { %2437 = vmatpush3.bf16.msra.mxu1 %v2588_v48 }
 0x598   : > { %2438 = vmatprep.subr.bf16.mxu1 %v2836_v2 }
 0x59b   : > { %2439 = vmatpush3.bf16.msra.mxu1 %v2589_v49 }
 0x59c   : > { %2440 = vmatprep.subr.bf16.mxu1 %v2836_v2 }
 0x59f   : > { %2441 = vmatpush3.bf16.msra.mxu1 %v2590_v50 }
 0x665   : > { %v1706_v24 = vpop.f32.mrb[20].mxu1 }
 0x666   : > { %v1707_v25 = vadd.f32 %v2279_v23, %v1706_v24  ;;  %v2424_v26 = vpop.f32.mrb[21].mxu1  ;;  %v2296_v23 = vld [vmem:[%s912_s16] ss:$0 sm:$0xff] }
 0x667   : > { %v1709_v27 = vpop.f32.mrb[22].mxu1 }
 0x668   : > { %v2425_v28 = vpop.f32.mrb[23].mxu1  ;;  %v1713_v29 = vadd.f32 %v1707_v25, %v3312_v5 }
 0x66a   : > { %v1716_v30 = vsel %vm946_vm2, %v1713_v29, 0.0 }
 0x66b   : > { %1717 = vadd.xlane.f32.xlu0 %v1716_v30 }
 0x6f8   : > { %v1718_v31 = vpop.xlane.xlu0 %1717 }
 0x6f9   : > { %v1720_v32 = vmul.f32 0.03125, %v1718_v31 }
 0x6fb   : > { %v1721_v33 = vsub.f32 %v1713_v29, %v1720_v32 }
 0x6fd   : > { %v1722_v34 = vmul.f32 %v1721_v33, %v1721_v33 }
 0x6ff   : > { %v1723_v35 = vsel %vm946_vm2, %v1722_v34, 0.0 }
 0x700   : > { %1724 = vadd.xlane.f32.xlu1 %v1723_v35 }
 0x78d   : > { %v1725_v5 = vpop.xlane.xlu1 %1724 }
 0x78e   : > { %v1726_v38 = vmul.f32 0.03125, %v1725_v5 }
 0x790   : > { %v1727_v39 = vadd.f32 1e-12, %v1726_v38 }
 0x792   : > { %2607 = vrsqrt.f32 %v1727_v39 }
 0x79c   : > { %v2608_v40 = vpop.eup %2607 }
 0x79d   : > { %v1729_v42 = vmul.f32 %v2608_v40, %v1721_v33 }
 0x79f   : > { %v1736_v44 = vmul.f32 %v2283_v41, %v1729_v42 }
 0x7a1   : > { %v1743_v45 = vadd.f32 %v2284_v43, %v1736_v44 }
 0x7a3   : > { %v1744_v46 = vpack.c.bf16 %v1743_v45, %v1743_v45 }
 0x7a5   : > { %2431 = vmatmul.mubr.msk.bf16.vlgmr.msra.gmra.mrb[24].mxu0 %vm946_vm2, %v1744_v46 }
 0x878   : > { %v1805_v52 = vpop.f32.mrb[24].mxu0 }
 0x879   : > { %v1806_v53 = vadd.f32 %v2285_v51, %v1805_v52  ;;  %v2432_v54 = vpop.f32.mrb[25].mxu0 }
 0x87a   : > { %v1808_v55 = vpop.f32.mrb[26].mxu0 }
 0x87b   : > { %v1812_v56 = vmul.f32 0.044715, %v1806_v53  ;;  %v2433_v57 = vpop.f32.mrb[27].mxu0  ;;  %v1811_v2 = vmul.f32 0.5, %v1806_v53 }
 0x87d   : > { %v1813_v58 = vmul.f32 %v1812_v56, %v1806_v53 }
 0x87f   : > { %v1814_v59 = vmul.f32 %v1813_v58, %v1806_v53 }
 0x881   : > { %v1815_v60 = vadd.f32 %v1814_v59, %v1806_v53 }
 0x883   : > { %v1816_v61 = vmul.f32 0.7978846, %v1815_v60 }
 0x885   : > { %2609 = vtanh.f32 %v1816_v61 }
 0x88f   : > { %v2610_v62 = vpop.eup %2609 }
 0x890   : > { %v1818_v63 = vadd.f32 1.0, %v2610_v62 }
 0x892   : > { %v1819_v0 = vmul.f32 %v1818_v63, %v1811_v2 }
 0x894   : > { %v1820_v1 = vpack.c.bf16 %v1819_v0, %v1819_v0 }
 0x896   : > { %2443 = vmatmul.mubr.msk.bf16.vlgmr.msra.gmra.mrb[24].mxu1 %vm1860_vm10, %v1820_v1 }
 0x969   : > { %v1898_v4 = vpop.f32.mrb[24].mxu1 }
 0x96a   : > { %v1899_v6 = vadd.f32 %v2289_v3, %v1898_v4  ;;  %v2444_v7 = vpop.f32.mrb[25].mxu1 }
 0x96b   : > { %v1901_v8 = vpop.f32.mrb[26].mxu1 }
 0x96c   : > { %v2445_v9 = vpop.f32.mrb[27].mxu1  ;;  %v1904_v10 = vadd.f32 %v1899_v6, %v1743_v45 }
 0x96e   : > { %v1907_v11 = vsel %vm946_vm2, %v1904_v10, 0.0 }
 0x96f   : > { %1908 = vadd.xlane.f32.xlu0 %v1907_v11 }
 0x9fc   : > { %v1909_v12 = vpop.xlane.xlu0 %1908 }
 0x9fd   : > { %v1910_v13 = vmul.f32 0.03125, %v1909_v12 }
 0x9ff   : > { %v1911_v14 = vsub.f32 %v1904_v10, %v1910_v13 }
 0xa01   : > { %v1912_v15 = vmul.f32 %v1911_v14, %v1911_v14 }
 0xa03   : > { %v1913_v16 = vsel %vm946_vm2, %v1912_v15, 0.0 }
 0xa04   : > { %1914 = vadd.xlane.f32.xlu0 %v1913_v16 }
 0xa91   : > { %v1915_v17 = vpop.xlane.xlu0 %1914 }
 0xa92   : > { %v1916_v18 = vmul.f32 0.03125, %v1915_v17 }
 0xa94   : > { %v1917_v19 = vadd.f32 1e-12, %v1916_v18 }
 0xa96   : > { %2611 = vrsqrt.f32 %v1917_v19 }
 0xaa0   : > { %v2612_v20 = vpop.eup %2611 }
 0xaa1   : > { %v1919_v22 = vmul.f32 %v2612_v20, %v1911_v14  ;;  %1938 = sbr.rel (%p2297_p3) target bundleno = 2729 (0xaa9), region = 112 }
 0xaa3   : > { %v1926_v24 = vmul.f32 %v2295_v21, %v1919_v22 }
 0xaa5   : > { %v1933_v25 = vadd.f32 %v2296_v23, %v1926_v24 }
 0xaa7   : > { %1934 = vst.msk [vmem:[#allocation2] sm:$0xff] %vm946_vm2, %v1933_v25 }
 0xaa8   : > { %1940 = vst.msk [vmem:[%s859_s0] sm:$0x1] %vm1939_vm11, %v1933_v25 }
 0xaa9 PF: > { %s3680_s6 = sld [smem:[#allocation22_spill]]  ;;  %s3681_s3 = sld [smem:[#allocation29_spill]] }
 0xaaa   : > { %s3682_s16 = sld [smem:[#allocation50_spill]]  ;;  %s1954_s22 = sshll.u32 %s859_s0, 4  ;;  %s1955_s22 = int_to_ptr.vmem [resolvable:$true] %s1954_s22 }
 0xaab   : > { %s1942_s1 = scalar_lea.sflag [#allocation9], %s3211_s27  ;;  %s2703_s26 = scalar_lea.vmem %s1955_s22, 16 }
 0xaac   : > { %p2704_p9 = scmp.ne.s32.totalorder %s1955_s22, %s2703_s26  ;;  %s2844_s8 = smov [#allocation13]  }
 0xaad   : > { %s2707_s7 = sshll.u32 %s2844_s8, 4  ;;  %s2708_s7 = int_to_ptr.vmem [resolvable:$false] %s2707_s7 }
 0xaae   : > { %s2709_s9 = scalar_lea.vmem %s2708_s7, 32  ;;  %p2710_p12 = scmp.lt.s32.totalorder %s1955_s22, %s2708_s7 }
 0xaaf   : > { %s2298_s17 = sshll.u32 %s3680_s6, 4  ;;  %p3683_p5 = scmp.ne.s32.totalorder %s3681_s3, 0 }
 0xab0   : > { %s3485_s4 = scalar_lea.hbm %s3682_s16, %s2298_s17  ;;  %p2711_p2 = scmp.lt.s32.totalorder %s2709_s9, %s2703_s26 }
 0xab1   : > { %p2705_p8 = pnand %p2704_p9, %p3683_p5 }
 0xab2   : > { %p2712_p1 = por %p2711_p2, %p2710_p12 }
 0xab3   : > { %p2706_p13 = pneg %p2705_p8 }
 0xab5   : > { %p2713_p10 = pnand %p2712_p1, %p2706_p13 }
 0xab7   : > { %2716 = shalt.err (!%p2713_p10)
}
 0xab8   : > { %s2717_s27 = scalar_lea.hbm %s3485_s4, 16  ;;  %s2721_s18 = scalar_lea.hbm %s3682_s16, 32 }
 0xab9   : > { %p2718_p0 = scmp.ne.s32.totalorder %s3485_s4, %s2717_s27  ;;  %p2722_p4 = scmp.lt.u32.totalorder %s3485_s4, %s3682_s16 }
 0xaba   : > { %p2723_p11 = scmp.lt.u32.totalorder %s2721_s18, %s2717_s27  ;;  %p2725_p9 = scmp.lt.u32.totalorder %s2717_s27, %s3485_s4 }
 0xabb   : > { %p2719_p6 = pnand %p2718_p0, %p3683_p5 }
 0xabc   : > { %p2724_p3 = por %p2723_p11, %p2722_p4 }
 0xabd   : > { %p2720_p7 = pneg %p2719_p6 }
 0xabe   : > { %p2726_p8 = por %p2725_p9, %p2724_p3 }
 0xac0   : > { %p2727_p13 = pnand %p2726_p8, %p2720_p7 }
 0xac2   : > { %2730 = shalt.err (!%p2727_p13)
}
 0xac3   : > { %2452 = dma.vmem_to_hbm [thread:$0]  (%p3683_p5), %s1955_s22, 16, %s3485_s4, %s1942_s1  }
 0xac4 PF: > { %s3684_s15 = sld [smem:[#allocation25_spill]]  ;;  %s3685_s23 = sld [smem:[#allocation19_spill]] }
 0xac5   : > { %s3686_s14 = sld [smem:[#allocation31_spill]] }
 0xaca   : > { %p2469_p12 = scmp.ge.s32.totalorder %s3684_s15, 2  ;;  %s1966_s19 = sand.u32 1, %s3685_s23  }
 0xacb   : > { %p3687_p2 = scmp.ne.s32.totalorder %s3686_s14, 0  ;;  %s1967_s5 = scalar_lea.sflag [#allocation9], %s1966_s19 }
 0xacd   : > { %p2465_p1 = pnand %p2469_p12, %p3687_p2 }
 0xacf   : > { %2784 = dma.done.wait (!%p2465_p1), %s1967_s5, 16  }
 0xad0   : > { %2786 = vsyncadd (!%p2465_p1), %s1967_s5, 4294967280  ;;  %s37_s2 = sadd.s32 1, %s3684_s15   ;;  %s3688_s27 = sld [smem:[#allocation17_spill]] }
 0xad1   : > { %p34_p10 = scmp.ge.s32.totalorder %s37_s2, 6   ;;  %s3689_s28 = sld [smem:[#allocation18_spill]] }
 0xad2   : > { %s3690_s29 = sld [smem:[#allocation27_spill]]  ;;  %s3691_s30 = sld [smem:[#allocation20_spill]] }
 0xad3   : > { %s3692_s0 = sld [smem:[#allocation21_spill]]  ;;  %s3693_s19 = sld [smem:[#allocation30_spill]] }
 0xad4   : > { %s3694_s1 = sld [smem:[#allocation23_spill]]  ;;  %s3695_s20 = sld [smem:[#allocation24_spill]] }
 0xad5   : > { %s3696_s21 = sld [smem:[#allocation26_spill]]  ;;  %s3697_s22 = sld [smem:[#allocation28_spill]] }
 0xad6   :  { %36 = sbr.rel (!%p34_p10) target bundleno = 31 (0x1f), region = 214 }
 0xadd   :  { %1971 = vsyncpa [#allocation8], 1 }
 0xade   :  { %1973 = vsyncpa [#allocation8 + $0x1], 1 }
 0xadf   :  { %1974 = vsyncpa [#allocation11], 1 }
 0xae0   :  { %1976 = vsyncpa [#allocation11 + $0x1], 1 }
 0xae1   :  { %1977 = vsyncpa [#allocation9], 1 }
 0xae2   :  { %1979 = vsyncpa [#allocation9 + $0x1], 1 }

</bundles_post_ra>
